<compile_context>
chip_gen: v7x
topology: tpu7x:2x2x1
jax: 0.10.0
libtpu: 0.0.40
codegen_flags: <defaults>
</compile_context>

<pallas_src>
import functools
import math

import jax
import jax.numpy as jnp
from jax.experimental import pallas as pl
from jax.experimental.pallas import tpu as pltpu

DIM = 2      # RealNVP2D input dimension (sampleMask() is 2-element)
LANES = 128  # TPU lane width


def _realnvp2d_kernel(x_ref, mask_ref, W0_ref, b0_ref, Wm_ref, bm_ref,
                      Wf_ref, bf_ref, out_ref, *, nof, n_mid, hidden, split_mid):
    X = x_ref[...]                                   # (D, TB) f32, batch on lanes
    tb = X.shape[1]
    jac = jnp.zeros((1, tb), jnp.float32)

    # Static unrolled flow loop (fine for small nof).
    # TODO(synk): switch to lax.fori_loop(..., unroll=True) over a reversed
    # index if nof is ever scaled past ~8 (bounds vreg live ranges / compile).
    for i in range(nof - 1, -1, -1):
        m = mask_ref[i]                              # (D, 1), broadcast over lanes
        one_m = 1.0 - m
        z1 = m * X                                   # (D, TB)

        # --- First layer on the VPU: K=2 contraction as broadcast FMAs. ---
        # (MXU pads K to 128, so dot() here is ~98% zero work; VALU has slack.)
        W0 = W0_ref[i]                               # (2H, D) f32
        acc = W0[:, 0:1] * z1[0:1, :]                # (2H,1)*(1,TB) -> (2H,TB)
        for j in range(1, DIM):
            acc = acc + W0[:, j:j + 1] * z1[j:j + 1, :]
        h = jnp.maximum(acc + b0_ref[i], 0.0)        # (2H, TB) f32

        # --- Mid layers on the MXU (bf16 operands, f32 accumulation). ---
        for l in range(n_mid):
            w = Wm_ref[i, l]                         # fused: (2H,2H); split: (2H,H)
            hx = h.astype(w.dtype)
            if split_mid:
                hn = jnp.concatenate(
                    [jnp.dot(w[0:hidden, :], hx[0:hidden, :],
                             preferred_element_type=jnp.float32),
                     jnp.dot(w[hidden:2 * hidden, :], hx[hidden:2 * hidden, :],
                             preferred_element_type=jnp.float32)], axis=0)
            else:
                hn = jnp.dot(w, hx, preferred_element_type=jnp.float32)
            h = jnp.maximum(hn + bm_ref[i, l], 0.0)  # bias/ReLU in f32

        # --- Final layer: (2D, 2H) @ (2H, TB); rows 0:D -> S, D:2D -> T. ---
        Wf = Wf_ref[i]
        out = jnp.dot(Wf, h.astype(Wf.dtype),
                      preferred_element_type=jnp.float32) + bf_ref[i]
        s = jnp.tanh(out[0:DIM, :]) * one_m          # (D, TB) f32
        t = out[DIM:2 * DIM, :] * one_m              # (D, TB) f32

        X = one_m * (X - t) * jnp.exp(-s) + z1
        jac = jac + jnp.sum(s, axis=0, keepdims=True)

    # prior.log_prob for a standard DIM-dimensional Normal.
    logp = (-0.5 * jnp.sum(X * X, axis=0, keepdims=True)
            - 0.5 * DIM * jnp.log(2.0 * jnp.pi))
    out_ref[...] = jac - logp                        # (1, TB) lane-dense store


def pack_params(params, *, use_bf16=True):
    """Transpose + fuse per-flow S/T weights for the batch-on-lanes kernel."""
    mask, sW0, sb0, sWm, sbm, sWf, sbf, tW0, tb0, tWm, tbm, tWf, tbf = params
    hidden = sW0.shape[2]
    split_mid = hidden >= 128   # block-diag is MXU-neutral only while H <= 64

    # First layer: stack S on top of T -> (nof, 2H, D); bias (nof, 2H, 1).
    # Kept f32: this layer is computed on the VPU inside the kernel.
    W0c = jnp.concatenate([jnp.swapaxes(sW0, 1, 2), jnp.swapaxes(tW0, 1, 2)], axis=1)
    b0c = jnp.concatenate([sb0, tb0], axis=1)[..., None]

    sWmT = jnp.swapaxes(sWm, 2, 3)
    tWmT = jnp.swapaxes(tWm, 2, 3)
    if split_mid:
        # (nof, L, 2H, H): rows 0:H are S weights, H:2H are T weights.
        Wmc = jnp.concatenate([sWmT, tWmT], axis=2)
    else:
        # Block-diagonal [[sWm^T, 0], [0, tWm^T]] -> (nof, L, 2H, 2H).
        z = jnp.zeros_like(sWmT)
        Wmc = jnp.concatenate([jnp.concatenate([sWmT, z], axis=3),
                               jnp.concatenate([z, tWmT], axis=3)], axis=2)
    bmc = jnp.concatenate([sbm, tbm], axis=2)[..., None]          # (nof, L, 2H, 1)

    # Final layer: block-diagonal [[sWf^T, 0], [0, tWf^T]] -> (nof, 2D, 2H).
    sWfT = jnp.swapaxes(sWf, 1, 2)
    tWfT = jnp.swapaxes(tWf, 1, 2)
    zf = jnp.zeros_like(sWfT)
    Wfc = jnp.concatenate([jnp.concatenate([sWfT, zf], axis=2),
                           jnp.concatenate([zf, tWfT], axis=2)], axis=1)
    bfc = jnp.concatenate([sbf, tbf], axis=1)[..., None]          # (nof, 2D, 1)

    if use_bf16:
        # bf16 only on MXU operands (v5e/v6e/v7x MXU-native); biases and all
        # elementwise math stay f32.  (v7x note: if quantizing further use
        # fp8, never int8 -- the v7x MXU has no int path.)
        Wmc = Wmc.astype(jnp.bfloat16)
        Wfc = Wfc.astype(jnp.bfloat16)

    maskc = mask[..., None]                                       # (nof, D, 1)
    return maskc, W0c, b0c, Wmc, bmc, Wfc, bfc, split_mid, hidden


def realnvp2d_forward(X, params, *, tile_b=2048, use_bf16=True):
    """Returns the scalar loss (jacobianLoss - prior_logprob).mean()."""
    (maskc, W0c, b0c, Wmc, bmc, Wfc, bfc,
     split_mid, hidden) = pack_params(params, use_bf16=use_bf16)

    B, d = X.shape
    assert d == DIM
    nof = maskc.shape[0]
    n_mid = Wmc.shape[1]

    # Adaptive batch tiling:
    #  * small batches pad only to the next 128 lanes (single grid step),
    #  * large batches use tile_b-sized tiles but guarantee >= 4 tiles so the
    #    v7x megacore pipeline has >= 2 steps per TensorCore.
    b_min = pl.cdiv(B, LANES) * LANES
    if b_min <= tile_b:
        tile_b_eff = b_min
    else:
        target = (pl.cdiv(b_min, 4) // LANES) * LANES
        tile_b_eff = max(LANES, min(tile_b, target))
    b_pad = pl.cdiv(b_min, tile_b_eff) * tile_b_eff

    # Batch-on-lanes layout.  TODO(synk): for multi-GB batches accept a
    # pre-transposed X to avoid this extra HBM write+read of the input.
    Xt = jnp.zeros((DIM, b_pad), jnp.float32).at[:, :B].set(
        X.T.astype(jnp.float32))

    weight_args = (maskc, W0c, b0c, Wmc, bmc, Wfc, bfc)

    def full_spec(a):
        nd = a.ndim
        return pl.BlockSpec(a.shape, lambda b, nd=nd: (0,) * nd)

    # Weights are <~2 MiB at these configs; for scaled-up nof/hidden, stream
    # per-flow weights (flow index on a trailing 'arbitrary' grid axis) and/or
    # set pltpu.CompilerParams(vmem_limit_bytes=...) against v7x's 64 MiB VMEM.
    per_sample = pl.pallas_call(
        functools.partial(_realnvp2d_kernel, nof=nof, n_mid=n_mid,
                          hidden=hidden, split_mid=split_mid),
        out_shape=jax.ShapeDtypeStruct((1, b_pad), jnp.float32),
        grid_spec=pltpu.PrefetchScalarGridSpec(
            num_scalar_prefetch=0,
            grid=(b_pad // tile_b_eff,),
            in_specs=[pl.BlockSpec((DIM, tile_b_eff), lambda b: (0, b))]
                     + [full_spec(a) for a in weight_args],
            out_specs=pl.BlockSpec((1, tile_b_eff), lambda b: (0, b)),
        ),
        compiler_params=pltpu.CompilerParams(dimension_semantics=("parallel",)),
    )(Xt, *weight_args)

    # Drop padding and finish the mean in plain JAX (cheap glue).
    return jnp.mean(per_sample[0, :B])


# ---------------- deterministic parameter construction (no checkpoints) -----------
def init_params(key, *, nof, hidden, n_mid):
    def linear(k, fan_in, fan_out):
        k1, k2 = jax.random.split(k)
        bound = 1.0 / math.sqrt(fan_in)
        W = jax.random.uniform(k1, (fan_in, fan_out), jnp.float32, -bound, bound)
        b = jax.random.uniform(k2, (fan_out,), jnp.float32, -bound, bound)
        return W, b

    n_keys = 2 * nof * (2 + n_mid)
    keys = iter(jax.random.split(key, n_keys))

    def stack_net():
        W0s, b0s, Wms, bms, Wfs, bfs = [], [], [], [], [], []
        for _ in range(nof):
            W0, b0 = linear(next(keys), DIM, hidden)
            Wm_l, bm_l = [], []
            for _ in range(n_mid):
                Wm, bm = linear(next(keys), hidden, hidden)
                Wm_l.append(Wm); bm_l.append(bm)
            Wf, bf = linear(next(keys), hidden, DIM)
            W0s.append(W0); b0s.append(b0)
            Wms.append(jnp.stack(Wm_l)); bms.append(jnp.stack(bm_l))
            Wfs.append(Wf); bfs.append(bf)
        return (jnp.stack(W0s), jnp.stack(b0s), jnp.stack(Wms),
                jnp.stack(bms), jnp.stack(Wfs), jnp.stack(bfs))

    sW0, sb0, sWm, sbm, sWf, sbf = stack_net()
    tW0, tb0, tWm, tbm, tWf, tbf = stack_net()

    # Deterministic stand-in for sampleMask(): alternate [0,1] / [1,0].
    mask = jnp.stack([jnp.array([0.0, 1.0]) if i % 2 == 0 else jnp.array([1.0, 0.0])
                      for i in range(nof)]).astype(jnp.float32)
    return (mask, sW0, sb0, sWm, sbm, sWf, sbf, tW0, tb0, tWm, tbm, tWf, tbf)


# ---------------- pure-JAX reference (for correctness check) ----------------------
def reference_forward(X, params):
    mask, sW0, sb0, sWm, sbm, sWf, sbf, tW0, tb0, tWm, tbm, tWf, tbf = params
    nof = mask.shape[0]
    n_mid = sWm.shape[1]

    def mlp(z, W0, b0, Wm, bm, Wf, bf):
        h = jnp.maximum(z @ W0 + b0, 0.0)
        for l in range(n_mid):
            h = jnp.maximum(h @ Wm[l] + bm[l], 0.0)
        return h @ Wf + bf

    jac = jnp.zeros((X.shape[0],), jnp.float32)
    for i in range(nof - 1, -1, -1):
        m = mask[i]
        one_m = 1.0 - m
        z1 = m * X
        s = jnp.tanh(mlp(z1, sW0[i], sb0[i], sWm[i], sbm[i], sWf[i], sbf[i])) * one_m
        t = mlp(z1, tW0[i], tb0[i], tWm[i], tbm[i], tWf[i], tbf[i]) * one_m
        X = one_m * (X - t) * jnp.exp(-s) + z1
        jac = jac + jnp.sum(s, axis=1)
    logp = -0.5 * jnp.sum(X * X, axis=1) - 0.5 * DIM * jnp.log(2.0 * jnp.pi)
    return jnp.mean(jac - logp)


if __name__ == "__main__":
    key = jax.random.PRNGKey(0)
    # Two configs: hidden=32 exercises the fused block-diag mid path,
    # hidden=128 exercises the split (H,H)@(H,TB) mid path.
    for (nof, hidden, n_mid, batch) in [(4, 32, 2, 64), (4, 128, 2, 64)]:
        k_params, k_x, key = jax.random.split(key, 3)
        params = init_params(k_params, nof=nof, hidden=hidden, n_mid=n_mid)
        X = jax.random.normal(k_x, (batch, DIM), dtype=jnp.float32)

        ref = jax.block_until_ready(reference_forward(X, params))

        # f32 matmul path (tight tolerance).
        loss_f32 = jax.block_until_ready(
            realnvp2d_forward(X, params, use_bf16=False))
        assert jnp.isfinite(loss_f32), "non-finite f32 loss"
        assert jnp.allclose(loss_f32, ref, rtol=1e-4, atol=1e-4), \
            (hidden, loss_f32, ref)

        # Default bf16-operand MXU path (f32 accumulation); looser tolerance.
        loss_bf16 = jax.block_until_ready(realnvp2d_forward(X, params))
        assert jnp.isfinite(loss_bf16), "non-finite bf16 loss"
        assert jnp.allclose(loss_bf16, ref, rtol=5e-2, atol=5e-2), \
            (hidden, loss_bf16, ref)

    print("KERNEL_OK")
</pallas_src>

<mosaic_0001>
module attributes {stable_mosaic.version = 11 : i64} {
  func.func @_realnvp2d_kernel(%arg0: i32, %arg1: memref<2x128xf32, #tpu.memory_space<vmem>>, %arg2: memref<4x2x1xf32, #tpu.memory_space<vmem>>, %arg3: memref<4x64x2xf32, #tpu.memory_space<vmem>>, %arg4: memref<4x64x1xf32, #tpu.memory_space<vmem>>, %arg5: memref<4x2x64x64xf32, #tpu.memory_space<vmem>>, %arg6: memref<4x2x64x1xf32, #tpu.memory_space<vmem>>, %arg7: memref<4x4x64xf32, #tpu.memory_space<vmem>>, %arg8: memref<4x4x1xf32, #tpu.memory_space<vmem>>, %arg9: memref<1x128xf32, #tpu.memory_space<vmem>>) attributes {dimension_semantics = [#tpu.dimension_semantics<parallel>], iteration_bounds = array<i64: 1>, scalar_prefetch = 0 : i64, scratch_operands = 0 : i64, tpu.core_type = #tpu.core_type<tc>, window_params = [{transform_indices = @transform_0, window_bounds = array<i64: 2, 128>}, {pipeline_mode = #tpu.pipeline_mode<synchronous>, transform_indices = @transform_1, window_bounds = array<i64: 4, 2, 1>}, {pipeline_mode = #tpu.pipeline_mode<synchronous>, transform_indices = @transform_2, window_bounds = array<i64: 4, 64, 2>}, {pipeline_mode = #tpu.pipeline_mode<synchronous>, transform_indices = @transform_3, window_bounds = array<i64: 4, 64, 1>}, {pipeline_mode = #tpu.pipeline_mode<synchronous>, transform_indices = @transform_4, window_bounds = array<i64: 4, 2, 64, 64>}, {pipeline_mode = #tpu.pipeline_mode<synchronous>, transform_indices = @transform_5, window_bounds = array<i64: 4, 2, 64, 1>}, {pipeline_mode = #tpu.pipeline_mode<synchronous>, transform_indices = @transform_6, window_bounds = array<i64: 4, 4, 64>}, {pipeline_mode = #tpu.pipeline_mode<synchronous>, transform_indices = @transform_7, window_bounds = array<i64: 4, 4, 1>}, {transform_indices = @transform_8, window_bounds = array<i64: 1, 128>}]} {
    %c0 = arith.constant 0 : index
    %c0_0 = arith.constant 0 : index
    %0 = vector.load %arg1[%c0, %c0_0] : memref<2x128xf32, #tpu.memory_space<vmem>>, vector<2x128xf32>
    %cst = arith.constant 0.000000e+00 : f32
    %1 = vector.broadcast %cst : f32 to vector<1x128xf32>
    %c3 = arith.constant 3 : index
    %c0_1 = arith.constant 0 : index
    %c0_2 = arith.constant 0 : index
    %2 = vector.load %arg2[%c3, %c0_1, %c0_2] : memref<4x2x1xf32, #tpu.memory_space<vmem>>, vector<1x2x1xf32>
    %3 = vector.shape_cast %2 : vector<1x2x1xf32> to vector<2x1xf32>
    %cst_3 = arith.constant 1.000000e+00 : f32
    %4 = vector.broadcast %cst_3 : f32 to vector<2x1xf32>
    %5 = arith.subf %4, %3 : vector<2x1xf32>
    %6 = vector.broadcast %3 : vector<2x1xf32> to vector<2x128xf32>
    %7 = arith.mulf %6, %0 : vector<2x128xf32>
    %c3_4 = arith.constant 3 : index
    %c0_5 = arith.constant 0 : index
    %c0_6 = arith.constant 0 : index
    %8 = vector.load %arg3[%c3_4, %c0_5, %c0_6] : memref<4x64x2xf32, #tpu.memory_space<vmem>>, vector<1x64x2xf32>
    %9 = vector.shape_cast %8 : vector<1x64x2xf32> to vector<64x2xf32>
    %10 = vector.extract_strided_slice %9 {offsets = [0, 0], sizes = [64, 1], strides = [1, 1]} : vector<64x2xf32> to vector<64x1xf32>
    %11 = vector.extract_strided_slice %7 {offsets = [0, 0], sizes = [1, 128], strides = [1, 1]} : vector<2x128xf32> to vector<1x128xf32>
    %12 = vector.broadcast %10 : vector<64x1xf32> to vector<64x128xf32>
    %13 = vector.broadcast %11 : vector<1x128xf32> to vector<64x128xf32>
    %14 = arith.mulf %12, %13 : vector<64x128xf32>
    %15 = vector.extract_strided_slice %9 {offsets = [0, 1], sizes = [64, 1], strides = [1, 1]} : vector<64x2xf32> to vector<64x1xf32>
    %16 = vector.extract_strided_slice %7 {offsets = [1, 0], sizes = [1, 128], strides = [1, 1]} : vector<2x128xf32> to vector<1x128xf32>
    %17 = vector.broadcast %15 : vector<64x1xf32> to vector<64x128xf32>
    %18 = vector.broadcast %16 : vector<1x128xf32> to vector<64x128xf32>
    %19 = arith.mulf %17, %18 : vector<64x128xf32>
    %20 = arith.addf %14, %19 : vector<64x128xf32>
    %c3_7 = arith.constant 3 : index
    %c0_8 = arith.constant 0 : index
    %c0_9 = arith.constant 0 : index
    %21 = vector.load %arg4[%c3_7, %c0_8, %c0_9] : memref<4x64x1xf32, #tpu.memory_space<vmem>>, vector<1x64x1xf32>
    %22 = vector.shape_cast %21 : vector<1x64x1xf32> to vector<64x1xf32>
    %23 = vector.broadcast %22 : vector<64x1xf32> to vector<64x128xf32>
    %24 = arith.addf %20, %23 : vector<64x128xf32>
    %cst_10 = arith.constant 0.000000e+00 : f32
    %25 = vector.broadcast %cst_10 : f32 to vector<64x128xf32>
    %26 = arith.maximumf %24, %25 : vector<64x128xf32>
    %c3_11 = arith.constant 3 : index
    %c0_12 = arith.constant 0 : index
    %c0_13 = arith.constant 0 : index
    %c0_14 = arith.constant 0 : index
    %27 = vector.load %arg5[%c3_11, %c0_12, %c0_13, %c0_14] : memref<4x2x64x64xf32, #tpu.memory_space<vmem>>, vector<1x1x64x64xf32>
    %28 = vector.shape_cast %27 : vector<1x1x64x64xf32> to vector<64x64xf32>
    %cst_15 = arith.constant dense<0.000000e+00> : vector<64x128xf32>
    %29 = tpu.matmul %28, %26, %cst_15 {dimension_numbers = #tpu.dot_dimension_numbers<[1], [0], [0], [1], [0, 0, 1, 1], [], []>} : vector<64x64xf32>, vector<64x128xf32>, vector<64x128xf32> -> vector<64x128xf32>
    %c3_16 = arith.constant 3 : index
    %c0_17 = arith.constant 0 : index
    %c0_18 = arith.constant 0 : index
    %c0_19 = arith.constant 0 : index
    %30 = vector.load %arg6[%c3_16, %c0_17, %c0_18, %c0_19] : memref<4x2x64x1xf32, #tpu.memory_space<vmem>>, vector<1x1x64x1xf32>
    %31 = vector.shape_cast %30 : vector<1x1x64x1xf32> to vector<64x1xf32>
    %32 = vector.broadcast %31 : vector<64x1xf32> to vector<64x128xf32>
    %33 = arith.addf %29, %32 : vector<64x128xf32>
    %cst_20 = arith.constant 0.000000e+00 : f32
    %34 = vector.broadcast %cst_20 : f32 to vector<64x128xf32>
    %35 = arith.maximumf %33, %34 : vector<64x128xf32>
    %c3_21 = arith.constant 3 : index
    %c1 = arith.constant 1 : index
    %c0_22 = arith.constant 0 : index
    %c0_23 = arith.constant 0 : index
    %36 = vector.load %arg5[%c3_21, %c1, %c0_22, %c0_23] : memref<4x2x64x64xf32, #tpu.memory_space<vmem>>, vector<1x1x64x64xf32>
    %37 = vector.shape_cast %36 : vector<1x1x64x64xf32> to vector<64x64xf32>
    %cst_24 = arith.constant dense<0.000000e+00> : vector<64x128xf32>
    %38 = tpu.matmul %37, %35, %cst_24 {dimension_numbers = #tpu.dot_dimension_numbers<[1], [0], [0], [1], [0, 0, 1, 1], [], []>} : vector<64x64xf32>, vector<64x128xf32>, vector<64x128xf32> -> vector<64x128xf32>
    %c3_25 = arith.constant 3 : index
    %c1_26 = arith.constant 1 : index
    %c0_27 = arith.constant 0 : index
    %c0_28 = arith.constant 0 : index
    %39 = vector.load %arg6[%c3_25, %c1_26, %c0_27, %c0_28] : memref<4x2x64x1xf32, #tpu.memory_space<vmem>>, vector<1x1x64x1xf32>
    %40 = vector.shape_cast %39 : vector<1x1x64x1xf32> to vector<64x1xf32>
    %41 = vector.broadcast %40 : vector<64x1xf32> to vector<64x128xf32>
    %42 = arith.addf %38, %41 : vector<64x128xf32>
    %cst_29 = arith.constant 0.000000e+00 : f32
    %43 = vector.broadcast %cst_29 : f32 to vector<64x128xf32>
    %44 = arith.maximumf %42, %43 : vector<64x128xf32>
    %c3_30 = arith.constant 3 : index
    %c0_31 = arith.constant 0 : index
    %c0_32 = arith.constant 0 : index
    %45 = vector.load %arg7[%c3_30, %c0_31, %c0_32] : memref<4x4x64xf32, #tpu.memory_space<vmem>>, vector<1x4x64xf32>
    %46 = vector.shape_cast %45 : vector<1x4x64xf32> to vector<4x64xf32>
    %cst_33 = arith.constant dense<0.000000e+00> : vector<4x128xf32>
    %47 = tpu.matmul %46, %44, %cst_33 {dimension_numbers = #tpu.dot_dimension_numbers<[1], [0], [0], [1], [0, 0, 1, 1], [], []>} : vector<4x64xf32>, vector<64x128xf32>, vector<4x128xf32> -> vector<4x128xf32>
    %c3_34 = arith.constant 3 : index
    %c0_35 = arith.constant 0 : index
    %c0_36 = arith.constant 0 : index
    %48 = vector.load %arg8[%c3_34, %c0_35, %c0_36] : memref<4x4x1xf32, #tpu.memory_space<vmem>>, vector<1x4x1xf32>
    %49 = vector.shape_cast %48 : vector<1x4x1xf32> to vector<4x1xf32>
    %50 = vector.broadcast %49 : vector<4x1xf32> to vector<4x128xf32>
    %51 = arith.addf %47, %50 : vector<4x128xf32>
    %52 = vector.extract_strided_slice %51 {offsets = [0, 0], sizes = [2, 128], strides = [1, 1]} : vector<4x128xf32> to vector<2x128xf32>
    %53 = math.tanh %52 : vector<2x128xf32>
    %54 = vector.broadcast %5 : vector<2x1xf32> to vector<2x128xf32>
    %55 = arith.mulf %53, %54 : vector<2x128xf32>
    %56 = vector.extract_strided_slice %51 {offsets = [2, 0], sizes = [2, 128], strides = [1, 1]} : vector<4x128xf32> to vector<2x128xf32>
    %57 = vector.broadcast %5 : vector<2x1xf32> to vector<2x128xf32>
    %58 = arith.mulf %56, %57 : vector<2x128xf32>
    %59 = arith.subf %0, %58 : vector<2x128xf32>
    %60 = vector.broadcast %5 : vector<2x1xf32> to vector<2x128xf32>
    %61 = arith.mulf %60, %59 : vector<2x128xf32>
    %cst_37 = arith.constant 0.000000e+00 : f32
    %62 = vector.broadcast %cst_37 : f32 to vector<2x128xf32>
    %63 = arith.subf %62, %55 : vector<2x128xf32>
    %64 = math.exp %63 : vector<2x128xf32>
    %65 = arith.mulf %61, %64 : vector<2x128xf32>
    %66 = arith.addf %65, %7 : vector<2x128xf32>
    %cst_38 = arith.constant dense<0.000000e+00> : vector<128xf32>
    %67 = vector.multi_reduction <add>, %55, %cst_38 [0] : vector<2x128xf32> to vector<128xf32>
    %68 = vector.shape_cast %67 : vector<128xf32> to vector<1x128xf32>
    %69 = arith.addf %1, %68 : vector<1x128xf32>
    %c2 = arith.constant 2 : index
    %c0_39 = arith.constant 0 : index
    %c0_40 = arith.constant 0 : index
    %70 = vector.load %arg2[%c2, %c0_39, %c0_40] : memref<4x2x1xf32, #tpu.memory_space<vmem>>, vector<1x2x1xf32>
    %71 = vector.shape_cast %70 : vector<1x2x1xf32> to vector<2x1xf32>
    %cst_41 = arith.constant 1.000000e+00 : f32
    %72 = vector.broadcast %cst_41 : f32 to vector<2x1xf32>
    %73 = arith.subf %72, %71 : vector<2x1xf32>
    %74 = vector.broadcast %71 : vector<2x1xf32> to vector<2x128xf32>
    %75 = arith.mulf %74, %66 : vector<2x128xf32>
    %c2_42 = arith.constant 2 : index
    %c0_43 = arith.constant 0 : index
    %c0_44 = arith.constant 0 : index
    %76 = vector.load %arg3[%c2_42, %c0_43, %c0_44] : memref<4x64x2xf32, #tpu.memory_space<vmem>>, vector<1x64x2xf32>
    %77 = vector.shape_cast %76 : vector<1x64x2xf32> to vector<64x2xf32>
    %78 = vector.extract_strided_slice %77 {offsets = [0, 0], sizes = [64, 1], strides = [1, 1]} : vector<64x2xf32> to vector<64x1xf32>
    %79 = vector.extract_strided_slice %75 {offsets = [0, 0], sizes = [1, 128], strides = [1, 1]} : vector<2x128xf32> to vector<1x128xf32>
    %80 = vector.broadcast %78 : vector<64x1xf32> to vector<64x128xf32>
    %81 = vector.broadcast %79 : vector<1x128xf32> to vector<64x128xf32>
    %82 = arith.mulf %80, %81 : vector<64x128xf32>
    %83 = vector.extract_strided_slice %77 {offsets = [0, 1], sizes = [64, 1], strides = [1, 1]} : vector<64x2xf32> to vector<64x1xf32>
    %84 = vector.extract_strided_slice %75 {offsets = [1, 0], sizes = [1, 128], strides = [1, 1]} : vector<2x128xf32> to vector<1x128xf32>
    %85 = vector.broadcast %83 : vector<64x1xf32> to vector<64x128xf32>
    %86 = vector.broadcast %84 : vector<1x128xf32> to vector<64x128xf32>
    %87 = arith.mulf %85, %86 : vector<64x128xf32>
    %88 = arith.addf %82, %87 : vector<64x128xf32>
    %c2_45 = arith.constant 2 : index
    %c0_46 = arith.constant 0 : index
    %c0_47 = arith.constant 0 : index
    %89 = vector.load %arg4[%c2_45, %c0_46, %c0_47] : memref<4x64x1xf32, #tpu.memory_space<vmem>>, vector<1x64x1xf32>
    %90 = vector.shape_cast %89 : vector<1x64x1xf32> to vector<64x1xf32>
    %91 = vector.broadcast %90 : vector<64x1xf32> to vector<64x128xf32>
    %92 = arith.addf %88, %91 : vector<64x128xf32>
    %cst_48 = arith.constant 0.000000e+00 : f32
    %93 = vector.broadcast %cst_48 : f32 to vector<64x128xf32>
    %94 = arith.maximumf %92, %93 : vector<64x128xf32>
    %c2_49 = arith.constant 2 : index
    %c0_50 = arith.constant 0 : index
    %c0_51 = arith.constant 0 : index
    %c0_52 = arith.constant 0 : index
    %95 = vector.load %arg5[%c2_49, %c0_50, %c0_51, %c0_52] : memref<4x2x64x64xf32, #tpu.memory_space<vmem>>, vector<1x1x64x64xf32>
    %96 = vector.shape_cast %95 : vector<1x1x64x64xf32> to vector<64x64xf32>
    %cst_53 = arith.constant dense<0.000000e+00> : vector<64x128xf32>
    %97 = tpu.matmul %96, %94, %cst_53 {dimension_numbers = #tpu.dot_dimension_numbers<[1], [0], [0], [1], [0, 0, 1, 1], [], []>} : vector<64x64xf32>, vector<64x128xf32>, vector<64x128xf32> -> vector<64x128xf32>
    %c2_54 = arith.constant 2 : index
    %c0_55 = arith.constant 0 : index
    %c0_56 = arith.constant 0 : index
    %c0_57 = arith.constant 0 : index
    %98 = vector.load %arg6[%c2_54, %c0_55, %c0_56, %c0_57] : memref<4x2x64x1xf32, #tpu.memory_space<vmem>>, vector<1x1x64x1xf32>
    %99 = vector.shape_cast %98 : vector<1x1x64x1xf32> to vector<64x1xf32>
    %100 = vector.broadcast %99 : vector<64x1xf32> to vector<64x128xf32>
    %101 = arith.addf %97, %100 : vector<64x128xf32>
    %cst_58 = arith.constant 0.000000e+00 : f32
    %102 = vector.broadcast %cst_58 : f32 to vector<64x128xf32>
    %103 = arith.maximumf %101, %102 : vector<64x128xf32>
    %c2_59 = arith.constant 2 : index
    %c1_60 = arith.constant 1 : index
    %c0_61 = arith.constant 0 : index
    %c0_62 = arith.constant 0 : index
    %104 = vector.load %arg5[%c2_59, %c1_60, %c0_61, %c0_62] : memref<4x2x64x64xf32, #tpu.memory_space<vmem>>, vector<1x1x64x64xf32>
    %105 = vector.shape_cast %104 : vector<1x1x64x64xf32> to vector<64x64xf32>
    %cst_63 = arith.constant dense<0.000000e+00> : vector<64x128xf32>
    %106 = tpu.matmul %105, %103, %cst_63 {dimension_numbers = #tpu.dot_dimension_numbers<[1], [0], [0], [1], [0, 0, 1, 1], [], []>} : vector<64x64xf32>, vector<64x128xf32>, vector<64x128xf32> -> vector<64x128xf32>
    %c2_64 = arith.constant 2 : index
    %c1_65 = arith.constant 1 : index
    %c0_66 = arith.constant 0 : index
    %c0_67 = arith.constant 0 : index
    %107 = vector.load %arg6[%c2_64, %c1_65, %c0_66, %c0_67] : memref<4x2x64x1xf32, #tpu.memory_space<vmem>>, vector<1x1x64x1xf32>
    %108 = vector.shape_cast %107 : vector<1x1x64x1xf32> to vector<64x1xf32>
    %109 = vector.broadcast %108 : vector<64x1xf32> to vector<64x128xf32>
    %110 = arith.addf %106, %109 : vector<64x128xf32>
    %cst_68 = arith.constant 0.000000e+00 : f32
    %111 = vector.broadcast %cst_68 : f32 to vector<64x128xf32>
    %112 = arith.maximumf %110, %111 : vector<64x128xf32>
    %c2_69 = arith.constant 2 : index
    %c0_70 = arith.constant 0 : index
    %c0_71 = arith.constant 0 : index
    %113 = vector.load %arg7[%c2_69, %c0_70, %c0_71] : memref<4x4x64xf32, #tpu.memory_space<vmem>>, vector<1x4x64xf32>
    %114 = vector.shape_cast %113 : vector<1x4x64xf32> to vector<4x64xf32>
    %cst_72 = arith.constant dense<0.000000e+00> : vector<4x128xf32>
    %115 = tpu.matmul %114, %112, %cst_72 {dimension_numbers = #tpu.dot_dimension_numbers<[1], [0], [0], [1], [0, 0, 1, 1], [], []>} : vector<4x64xf32>, vector<64x128xf32>, vector<4x128xf32> -> vector<4x128xf32>
    %c2_73 = arith.constant 2 : index
    %c0_74 = arith.constant 0 : index
    %c0_75 = arith.constant 0 : index
    %116 = vector.load %arg8[%c2_73, %c0_74, %c0_75] : memref<4x4x1xf32, #tpu.memory_space<vmem>>, vector<1x4x1xf32>
    %117 = vector.shape_cast %116 : vector<1x4x1xf32> to vector<4x1xf32>
    %118 = vector.broadcast %117 : vector<4x1xf32> to vector<4x128xf32>
    %119 = arith.addf %115, %118 : vector<4x128xf32>
    %120 = vector.extract_strided_slice %119 {offsets = [0, 0], sizes = [2, 128], strides = [1, 1]} : vector<4x128xf32> to vector<2x128xf32>
    %121 = math.tanh %120 : vector<2x128xf32>
    %122 = vector.broadcast %73 : vector<2x1xf32> to vector<2x128xf32>
    %123 = arith.mulf %121, %122 : vector<2x128xf32>
    %124 = vector.extract_strided_slice %119 {offsets = [2, 0], sizes = [2, 128], strides = [1, 1]} : vector<4x128xf32> to vector<2x128xf32>
    %125 = vector.broadcast %73 : vector<2x1xf32> to vector<2x128xf32>
    %126 = arith.mulf %124, %125 : vector<2x128xf32>
    %127 = arith.subf %66, %126 : vector<2x128xf32>
    %128 = vector.broadcast %73 : vector<2x1xf32> to vector<2x128xf32>
    %129 = arith.mulf %128, %127 : vector<2x128xf32>
    %cst_76 = arith.constant 0.000000e+00 : f32
    %130 = vector.broadcast %cst_76 : f32 to vector<2x128xf32>
    %131 = arith.subf %130, %123 : vector<2x128xf32>
    %132 = math.exp %131 : vector<2x128xf32>
    %133 = arith.mulf %129, %132 : vector<2x128xf32>
    %134 = arith.addf %133, %75 : vector<2x128xf32>
    %cst_77 = arith.constant dense<0.000000e+00> : vector<128xf32>
    %135 = vector.multi_reduction <add>, %123, %cst_77 [0] : vector<2x128xf32> to vector<128xf32>
    %136 = vector.shape_cast %135 : vector<128xf32> to vector<1x128xf32>
    %137 = arith.addf %69, %136 : vector<1x128xf32>
    %c1_78 = arith.constant 1 : index
    %c0_79 = arith.constant 0 : index
    %c0_80 = arith.constant 0 : index
    %138 = vector.load %arg2[%c1_78, %c0_79, %c0_80] : memref<4x2x1xf32, #tpu.memory_space<vmem>>, vector<1x2x1xf32>
    %139 = vector.shape_cast %138 : vector<1x2x1xf32> to vector<2x1xf32>
    %cst_81 = arith.constant 1.000000e+00 : f32
    %140 = vector.broadcast %cst_81 : f32 to vector<2x1xf32>
    %141 = arith.subf %140, %139 : vector<2x1xf32>
    %142 = vector.broadcast %139 : vector<2x1xf32> to vector<2x128xf32>
    %143 = arith.mulf %142, %134 : vector<2x128xf32>
    %c1_82 = arith.constant 1 : index
    %c0_83 = arith.constant 0 : index
    %c0_84 = arith.constant 0 : index
    %144 = vector.load %arg3[%c1_82, %c0_83, %c0_84] : memref<4x64x2xf32, #tpu.memory_space<vmem>>, vector<1x64x2xf32>
    %145 = vector.shape_cast %144 : vector<1x64x2xf32> to vector<64x2xf32>
    %146 = vector.extract_strided_slice %145 {offsets = [0, 0], sizes = [64, 1], strides = [1, 1]} : vector<64x2xf32> to vector<64x1xf32>
    %147 = vector.extract_strided_slice %143 {offsets = [0, 0], sizes = [1, 128], strides = [1, 1]} : vector<2x128xf32> to vector<1x128xf32>
    %148 = vector.broadcast %146 : vector<64x1xf32> to vector<64x128xf32>
    %149 = vector.broadcast %147 : vector<1x128xf32> to vector<64x128xf32>
    %150 = arith.mulf %148, %149 : vector<64x128xf32>
    %151 = vector.extract_strided_slice %145 {offsets = [0, 1], sizes = [64, 1], strides = [1, 1]} : vector<64x2xf32> to vector<64x1xf32>
    %152 = vector.extract_strided_slice %143 {offsets = [1, 0], sizes = [1, 128], strides = [1, 1]} : vector<2x128xf32> to vector<1x128xf32>
    %153 = vector.broadcast %151 : vector<64x1xf32> to vector<64x128xf32>
    %154 = vector.broadcast %152 : vector<1x128xf32> to vector<64x128xf32>
    %155 = arith.mulf %153, %154 : vector<64x128xf32>
    %156 = arith.addf %150, %155 : vector<64x128xf32>
    %c1_85 = arith.constant 1 : index
    %c0_86 = arith.constant 0 : index
    %c0_87 = arith.constant 0 : index
    %157 = vector.load %arg4[%c1_85, %c0_86, %c0_87] : memref<4x64x1xf32, #tpu.memory_space<vmem>>, vector<1x64x1xf32>
    %158 = vector.shape_cast %157 : vector<1x64x1xf32> to vector<64x1xf32>
    %159 = vector.broadcast %158 : vector<64x1xf32> to vector<64x128xf32>
    %160 = arith.addf %156, %159 : vector<64x128xf32>
    %cst_88 = arith.constant 0.000000e+00 : f32
    %161 = vector.broadcast %cst_88 : f32 to vector<64x128xf32>
    %162 = arith.maximumf %160, %161 : vector<64x128xf32>
    %c1_89 = arith.constant 1 : index
    %c0_90 = arith.constant 0 : index
    %c0_91 = arith.constant 0 : index
    %c0_92 = arith.constant 0 : index
    %163 = vector.load %arg5[%c1_89, %c0_90, %c0_91, %c0_92] : memref<4x2x64x64xf32, #tpu.memory_space<vmem>>, vector<1x1x64x64xf32>
    %164 = vector.shape_cast %163 : vector<1x1x64x64xf32> to vector<64x64xf32>
    %cst_93 = arith.constant dense<0.000000e+00> : vector<64x128xf32>
    %165 = tpu.matmul %164, %162, %cst_93 {dimension_numbers = #tpu.dot_dimension_numbers<[1], [0], [0], [1], [0, 0, 1, 1], [], []>} : vector<64x64xf32>, vector<64x128xf32>, vector<64x128xf32> -> vector<64x128xf32>
    %c1_94 = arith.constant 1 : index
    %c0_95 = arith.constant 0 : index
    %c0_96 = arith.constant 0 : index
    %c0_97 = arith.constant 0 : index
    %166 = vector.load %arg6[%c1_94, %c0_95, %c0_96, %c0_97] : memref<4x2x64x1xf32, #tpu.memory_space<vmem>>, vector<1x1x64x1xf32>
    %167 = vector.shape_cast %166 : vector<1x1x64x1xf32> to vector<64x1xf32>
    %168 = vector.broadcast %167 : vector<64x1xf32> to vector<64x128xf32>
    %169 = arith.addf %165, %168 : vector<64x128xf32>
    %cst_98 = arith.constant 0.000000e+00 : f32
    %170 = vector.broadcast %cst_98 : f32 to vector<64x128xf32>
    %171 = arith.maximumf %169, %170 : vector<64x128xf32>
    %c1_99 = arith.constant 1 : index
    %c1_100 = arith.constant 1 : index
    %c0_101 = arith.constant 0 : index
    %c0_102 = arith.constant 0 : index
    %172 = vector.load %arg5[%c1_99, %c1_100, %c0_101, %c0_102] : memref<4x2x64x64xf32, #tpu.memory_space<vmem>>, vector<1x1x64x64xf32>
    %173 = vector.shape_cast %172 : vector<1x1x64x64xf32> to vector<64x64xf32>
    %cst_103 = arith.constant dense<0.000000e+00> : vector<64x128xf32>
    %174 = tpu.matmul %173, %171, %cst_103 {dimension_numbers = #tpu.dot_dimension_numbers<[1], [0], [0], [1], [0, 0, 1, 1], [], []>} : vector<64x64xf32>, vector<64x128xf32>, vector<64x128xf32> -> vector<64x128xf32>
    %c1_104 = arith.constant 1 : index
    %c1_105 = arith.constant 1 : index
    %c0_106 = arith.constant 0 : index
    %c0_107 = arith.constant 0 : index
    %175 = vector.load %arg6[%c1_104, %c1_105, %c0_106, %c0_107] : memref<4x2x64x1xf32, #tpu.memory_space<vmem>>, vector<1x1x64x1xf32>
    %176 = vector.shape_cast %175 : vector<1x1x64x1xf32> to vector<64x1xf32>
    %177 = vector.broadcast %176 : vector<64x1xf32> to vector<64x128xf32>
    %178 = arith.addf %174, %177 : vector<64x128xf32>
    %cst_108 = arith.constant 0.000000e+00 : f32
    %179 = vector.broadcast %cst_108 : f32 to vector<64x128xf32>
    %180 = arith.maximumf %178, %179 : vector<64x128xf32>
    %c1_109 = arith.constant 1 : index
    %c0_110 = arith.constant 0 : index
    %c0_111 = arith.constant 0 : index
    %181 = vector.load %arg7[%c1_109, %c0_110, %c0_111] : memref<4x4x64xf32, #tpu.memory_space<vmem>>, vector<1x4x64xf32>
    %182 = vector.shape_cast %181 : vector<1x4x64xf32> to vector<4x64xf32>
    %cst_112 = arith.constant dense<0.000000e+00> : vector<4x128xf32>
    %183 = tpu.matmul %182, %180, %cst_112 {dimension_numbers = #tpu.dot_dimension_numbers<[1], [0], [0], [1], [0, 0, 1, 1], [], []>} : vector<4x64xf32>, vector<64x128xf32>, vector<4x128xf32> -> vector<4x128xf32>
    %c1_113 = arith.constant 1 : index
    %c0_114 = arith.constant 0 : index
    %c0_115 = arith.constant 0 : index
    %184 = vector.load %arg8[%c1_113, %c0_114, %c0_115] : memref<4x4x1xf32, #tpu.memory_space<vmem>>, vector<1x4x1xf32>
    %185 = vector.shape_cast %184 : vector<1x4x1xf32> to vector<4x1xf32>
    %186 = vector.broadcast %185 : vector<4x1xf32> to vector<4x128xf32>
    %187 = arith.addf %183, %186 : vector<4x128xf32>
    %188 = vector.extract_strided_slice %187 {offsets = [0, 0], sizes = [2, 128], strides = [1, 1]} : vector<4x128xf32> to vector<2x128xf32>
    %189 = math.tanh %188 : vector<2x128xf32>
    %190 = vector.broadcast %141 : vector<2x1xf32> to vector<2x128xf32>
    %191 = arith.mulf %189, %190 : vector<2x128xf32>
    %192 = vector.extract_strided_slice %187 {offsets = [2, 0], sizes = [2, 128], strides = [1, 1]} : vector<4x128xf32> to vector<2x128xf32>
    %193 = vector.broadcast %141 : vector<2x1xf32> to vector<2x128xf32>
    %194 = arith.mulf %192, %193 : vector<2x128xf32>
    %195 = arith.subf %134, %194 : vector<2x128xf32>
    %196 = vector.broadcast %141 : vector<2x1xf32> to vector<2x128xf32>
    %197 = arith.mulf %196, %195 : vector<2x128xf32>
    %cst_116 = arith.constant 0.000000e+00 : f32
    %198 = vector.broadcast %cst_116 : f32 to vector<2x128xf32>
    %199 = arith.subf %198, %191 : vector<2x128xf32>
    %200 = math.exp %199 : vector<2x128xf32>
    %201 = arith.mulf %197, %200 : vector<2x128xf32>
    %202 = arith.addf %201, %143 : vector<2x128xf32>
    %cst_117 = arith.constant dense<0.000000e+00> : vector<128xf32>
    %203 = vector.multi_reduction <add>, %191, %cst_117 [0] : vector<2x128xf32> to vector<128xf32>
    %204 = vector.shape_cast %203 : vector<128xf32> to vector<1x128xf32>
    %205 = arith.addf %137, %204 : vector<1x128xf32>
    %c0_118 = arith.constant 0 : index
    %c0_119 = arith.constant 0 : index
    %c0_120 = arith.constant 0 : index
    %206 = vector.load %arg2[%c0_118, %c0_119, %c0_120] : memref<4x2x1xf32, #tpu.memory_space<vmem>>, vector<1x2x1xf32>
    %207 = vector.shape_cast %206 : vector<1x2x1xf32> to vector<2x1xf32>
    %cst_121 = arith.constant 1.000000e+00 : f32
    %208 = vector.broadcast %cst_121 : f32 to vector<2x1xf32>
    %209 = arith.subf %208, %207 : vector<2x1xf32>
    %210 = vector.broadcast %207 : vector<2x1xf32> to vector<2x128xf32>
    %211 = arith.mulf %210, %202 : vector<2x128xf32>
    %c0_122 = arith.constant 0 : index
    %c0_123 = arith.constant 0 : index
    %c0_124 = arith.constant 0 : index
    %212 = vector.load %arg3[%c0_122, %c0_123, %c0_124] : memref<4x64x2xf32, #tpu.memory_space<vmem>>, vector<1x64x2xf32>
    %213 = vector.shape_cast %212 : vector<1x64x2xf32> to vector<64x2xf32>
    %214 = vector.extract_strided_slice %213 {offsets = [0, 0], sizes = [64, 1], strides = [1, 1]} : vector<64x2xf32> to vector<64x1xf32>
    %215 = vector.extract_strided_slice %211 {offsets = [0, 0], sizes = [1, 128], strides = [1, 1]} : vector<2x128xf32> to vector<1x128xf32>
    %216 = vector.broadcast %214 : vector<64x1xf32> to vector<64x128xf32>
    %217 = vector.broadcast %215 : vector<1x128xf32> to vector<64x128xf32>
    %218 = arith.mulf %216, %217 : vector<64x128xf32>
    %219 = vector.extract_strided_slice %213 {offsets = [0, 1], sizes = [64, 1], strides = [1, 1]} : vector<64x2xf32> to vector<64x1xf32>
    %220 = vector.extract_strided_slice %211 {offsets = [1, 0], sizes = [1, 128], strides = [1, 1]} : vector<2x128xf32> to vector<1x128xf32>
    %221 = vector.broadcast %219 : vector<64x1xf32> to vector<64x128xf32>
    %222 = vector.broadcast %220 : vector<1x128xf32> to vector<64x128xf32>
    %223 = arith.mulf %221, %222 : vector<64x128xf32>
    %224 = arith.addf %218, %223 : vector<64x128xf32>
    %c0_125 = arith.constant 0 : index
    %c0_126 = arith.constant 0 : index
    %c0_127 = arith.constant 0 : index
    %225 = vector.load %arg4[%c0_125, %c0_126, %c0_127] : memref<4x64x1xf32, #tpu.memory_space<vmem>>, vector<1x64x1xf32>
    %226 = vector.shape_cast %225 : vector<1x64x1xf32> to vector<64x1xf32>
    %227 = vector.broadcast %226 : vector<64x1xf32> to vector<64x128xf32>
    %228 = arith.addf %224, %227 : vector<64x128xf32>
    %cst_128 = arith.constant 0.000000e+00 : f32
    %229 = vector.broadcast %cst_128 : f32 to vector<64x128xf32>
    %230 = arith.maximumf %228, %229 : vector<64x128xf32>
    %c0_129 = arith.constant 0 : index
    %c0_130 = arith.constant 0 : index
    %c0_131 = arith.constant 0 : index
    %c0_132 = arith.constant 0 : index
    %231 = vector.load %arg5[%c0_129, %c0_130, %c0_131, %c0_132] : memref<4x2x64x64xf32, #tpu.memory_space<vmem>>, vector<1x1x64x64xf32>
    %232 = vector.shape_cast %231 : vector<1x1x64x64xf32> to vector<64x64xf32>
    %cst_133 = arith.constant dense<0.000000e+00> : vector<64x128xf32>
    %233 = tpu.matmul %232, %230, %cst_133 {dimension_numbers = #tpu.dot_dimension_numbers<[1], [0], [0], [1], [0, 0, 1, 1], [], []>} : vector<64x64xf32>, vector<64x128xf32>, vector<64x128xf32> -> vector<64x128xf32>
    %c0_134 = arith.constant 0 : index
    %c0_135 = arith.constant 0 : index
    %c0_136 = arith.constant 0 : index
    %c0_137 = arith.constant 0 : index
    %234 = vector.load %arg6[%c0_134, %c0_135, %c0_136, %c0_137] : memref<4x2x64x1xf32, #tpu.memory_space<vmem>>, vector<1x1x64x1xf32>
    %235 = vector.shape_cast %234 : vector<1x1x64x1xf32> to vector<64x1xf32>
    %236 = vector.broadcast %235 : vector<64x1xf32> to vector<64x128xf32>
    %237 = arith.addf %233, %236 : vector<64x128xf32>
    %cst_138 = arith.constant 0.000000e+00 : f32
    %238 = vector.broadcast %cst_138 : f32 to vector<64x128xf32>
    %239 = arith.maximumf %237, %238 : vector<64x128xf32>
    %c0_139 = arith.constant 0 : index
    %c1_140 = arith.constant 1 : index
    %c0_141 = arith.constant 0 : index
    %c0_142 = arith.constant 0 : index
    %240 = vector.load %arg5[%c0_139, %c1_140, %c0_141, %c0_142] : memref<4x2x64x64xf32, #tpu.memory_space<vmem>>, vector<1x1x64x64xf32>
    %241 = vector.shape_cast %240 : vector<1x1x64x64xf32> to vector<64x64xf32>
    %cst_143 = arith.constant dense<0.000000e+00> : vector<64x128xf32>
    %242 = tpu.matmul %241, %239, %cst_143 {dimension_numbers = #tpu.dot_dimension_numbers<[1], [0], [0], [1], [0, 0, 1, 1], [], []>} : vector<64x64xf32>, vector<64x128xf32>, vector<64x128xf32> -> vector<64x128xf32>
    %c0_144 = arith.constant 0 : index
    %c1_145 = arith.constant 1 : index
    %c0_146 = arith.constant 0 : index
    %c0_147 = arith.constant 0 : index
    %243 = vector.load %arg6[%c0_144, %c1_145, %c0_146, %c0_147] : memref<4x2x64x1xf32, #tpu.memory_space<vmem>>, vector<1x1x64x1xf32>
    %244 = vector.shape_cast %243 : vector<1x1x64x1xf32> to vector<64x1xf32>
    %245 = vector.broadcast %244 : vector<64x1xf32> to vector<64x128xf32>
    %246 = arith.addf %242, %245 : vector<64x128xf32>
    %cst_148 = arith.constant 0.000000e+00 : f32
    %247 = vector.broadcast %cst_148 : f32 to vector<64x128xf32>
    %248 = arith.maximumf %246, %247 : vector<64x128xf32>
    %c0_149 = arith.constant 0 : index
    %c0_150 = arith.constant 0 : index
    %c0_151 = arith.constant 0 : index
    %249 = vector.load %arg7[%c0_149, %c0_150, %c0_151] : memref<4x4x64xf32, #tpu.memory_space<vmem>>, vector<1x4x64xf32>
    %250 = vector.shape_cast %249 : vector<1x4x64xf32> to vector<4x64xf32>
    %cst_152 = arith.constant dense<0.000000e+00> : vector<4x128xf32>
    %251 = tpu.matmul %250, %248, %cst_152 {dimension_numbers = #tpu.dot_dimension_numbers<[1], [0], [0], [1], [0, 0, 1, 1], [], []>} : vector<4x64xf32>, vector<64x128xf32>, vector<4x128xf32> -> vector<4x128xf32>
    %c0_153 = arith.constant 0 : index
    %c0_154 = arith.constant 0 : index
    %c0_155 = arith.constant 0 : index
    %252 = vector.load %arg8[%c0_153, %c0_154, %c0_155] : memref<4x4x1xf32, #tpu.memory_space<vmem>>, vector<1x4x1xf32>
    %253 = vector.shape_cast %252 : vector<1x4x1xf32> to vector<4x1xf32>
    %254 = vector.broadcast %253 : vector<4x1xf32> to vector<4x128xf32>
    %255 = arith.addf %251, %254 : vector<4x128xf32>
    %256 = vector.extract_strided_slice %255 {offsets = [0, 0], sizes = [2, 128], strides = [1, 1]} : vector<4x128xf32> to vector<2x128xf32>
    %257 = math.tanh %256 : vector<2x128xf32>
    %258 = vector.broadcast %209 : vector<2x1xf32> to vector<2x128xf32>
    %259 = arith.mulf %257, %258 : vector<2x128xf32>
    %260 = vector.extract_strided_slice %255 {offsets = [2, 0], sizes = [2, 128], strides = [1, 1]} : vector<4x128xf32> to vector<2x128xf32>
    %261 = vector.broadcast %209 : vector<2x1xf32> to vector<2x128xf32>
    %262 = arith.mulf %260, %261 : vector<2x128xf32>
    %263 = arith.subf %202, %262 : vector<2x128xf32>
    %264 = vector.broadcast %209 : vector<2x1xf32> to vector<2x128xf32>
    %265 = arith.mulf %264, %263 : vector<2x128xf32>
    %cst_156 = arith.constant 0.000000e+00 : f32
    %266 = vector.broadcast %cst_156 : f32 to vector<2x128xf32>
    %267 = arith.subf %266, %259 : vector<2x128xf32>
    %268 = math.exp %267 : vector<2x128xf32>
    %269 = arith.mulf %265, %268 : vector<2x128xf32>
    %270 = arith.addf %269, %211 : vector<2x128xf32>
    %cst_157 = arith.constant dense<0.000000e+00> : vector<128xf32>
    %271 = vector.multi_reduction <add>, %259, %cst_157 [0] : vector<2x128xf32> to vector<128xf32>
    %272 = vector.shape_cast %271 : vector<128xf32> to vector<1x128xf32>
    %273 = arith.addf %205, %272 : vector<1x128xf32>
    %274 = arith.mulf %270, %270 : vector<2x128xf32>
    %cst_158 = arith.constant dense<0.000000e+00> : vector<128xf32>
    %275 = vector.multi_reduction <add>, %274, %cst_158 [0] : vector<2x128xf32> to vector<128xf32>
    %276 = vector.shape_cast %275 : vector<128xf32> to vector<1x128xf32>
    %cst_159 = arith.constant -5.000000e-01 : f32
    %277 = vector.broadcast %cst_159 : f32 to vector<1x128xf32>
    %278 = arith.mulf %277, %276 : vector<1x128xf32>
    %cst_160 = arith.constant 6.28318548 : f32
    %279 = math.log %cst_160 : f32
    %cst_161 = arith.constant 1.000000e+00 : f32
    %280 = arith.mulf %cst_161, %279 : f32
    %281 = vector.broadcast %280 : f32 to vector<1x128xf32>
    %282 = arith.subf %278, %281 : vector<1x128xf32>
    %283 = arith.subf %273, %282 : vector<1x128xf32>
    %c0_162 = arith.constant 0 : index
    %c0_163 = arith.constant 0 : index
    %284 = vector.load %arg9[%c0_162, %c0_163] : memref<1x128xf32, #tpu.memory_space<vmem>>, vector<1x128xf32>
    tpu.vector_store %arg9[%c0_162, %c0_163], %283 {strides = array<i32>} : memref<1x128xf32, #tpu.memory_space<vmem>>, vector<1x128xf32>,
    return
  }
  func.func @transform_0(%arg0: i32) -> (i32, i32) {
    %c0_i32 = arith.constant 0 : i32
    %c0_i32_0 = arith.constant 0 : i32
    return %c0_i32, %arg0 : i32, i32
  }
  func.func @transform_1(%arg0: i32) -> (i32, i32, i32) {
    %c0_i32 = arith.constant 0 : i32
    %c0_i32_0 = arith.constant 0 : i32
    %c0_i32_1 = arith.constant 0 : i32
    %c0_i32_2 = arith.constant 0 : i32
    return %c0_i32, %c0_i32_0, %c0_i32_1 : i32, i32, i32
  }
  func.func @transform_2(%arg0: i32) -> (i32, i32, i32) {
    %c0_i32 = arith.constant 0 : i32
    %c0_i32_0 = arith.constant 0 : i32
    %c0_i32_1 = arith.constant 0 : i32
    %c0_i32_2 = arith.constant 0 : i32
    return %c0_i32, %c0_i32_0, %c0_i32_1 : i32, i32, i32
  }
  func.func @transform_3(%arg0: i32) -> (i32, i32, i32) {
    %c0_i32 = arith.constant 0 : i32
    %c0_i32_0 = arith.constant 0 : i32
    %c0_i32_1 = arith.constant 0 : i32
    %c0_i32_2 = arith.constant 0 : i32
    return %c0_i32, %c0_i32_0, %c0_i32_1 : i32, i32, i32
  }
  func.func @transform_4(%arg0: i32) -> (i32, i32, i32, i32) {
    %c0_i32 = arith.constant 0 : i32
    %c0_i32_0 = arith.constant 0 : i32
    %c0_i32_1 = arith.constant 0 : i32
    %c0_i32_2 = arith.constant 0 : i32
    %c0_i32_3 = arith.constant 0 : i32
    return %c0_i32, %c0_i32_0, %c0_i32_1, %c0_i32_2 : i32, i32, i32, i32
  }
  func.func @transform_5(%arg0: i32) -> (i32, i32, i32, i32) {
    %c0_i32 = arith.constant 0 : i32
    %c0_i32_0 = arith.constant 0 : i32
    %c0_i32_1 = arith.constant 0 : i32
    %c0_i32_2 = arith.constant 0 : i32
    %c0_i32_3 = arith.constant 0 : i32
    return %c0_i32, %c0_i32_0, %c0_i32_1, %c0_i32_2 : i32, i32, i32, i32
  }
  func.func @transform_6(%arg0: i32) -> (i32, i32, i32) {
    %c0_i32 = arith.constant 0 : i32
    %c0_i32_0 = arith.constant 0 : i32
    %c0_i32_1 = arith.constant 0 : i32
    %c0_i32_2 = arith.constant 0 : i32
    return %c0_i32, %c0_i32_0, %c0_i32_1 : i32, i32, i32
  }
  func.func @transform_7(%arg0: i32) -> (i32, i32, i32) {
    %c0_i32 = arith.constant 0 : i32
    %c0_i32_0 = arith.constant 0 : i32
    %c0_i32_1 = arith.constant 0 : i32
    %c0_i32_2 = arith.constant 0 : i32
    return %c0_i32, %c0_i32_0, %c0_i32_1 : i32, i32, i32
  }
  func.func @transform_8(%arg0: i32) -> (i32, i32) {
    %c0_i32 = arith.constant 0 : i32
    %c0_i32_0 = arith.constant 0 : i32
    return %c0_i32, %arg0 : i32, i32
  }
}

</mosaic_0001>

<bundles_post_ra>
// kernel: tpu_custom_call.1
= control target key start
LH: loop header
LB: loop body
LE: loop exit
PB: predicated region body
PF: predicated region fallthrough
CT: control target
= control target key end

     0   :  { %v3765_v1 = vmov 1   ;;  %v3766_v2 = vmov 0   ;;  %s4686_s0 = inlined_call_operand.vmem [shape: f32[2,128], index: 0, kind: input, shape index: {}]   ;;  %s4687_s1 = inlined_call_operand.vmem [shape: f32[4,2,1], index: 1, kind: input, shape index: {}]   ;;  %s4688_s2 = inlined_call_operand.vmem [shape: f32[4,64,2], index: 2, kind: input, shape index: {}]   ;;  %s4689_s3 = inlined_call_operand.vmem [shape: f32[4,64,1], index: 3, kind: input, shape index: {}]   ;;  %s4690_s4 = inlined_call_operand.vmem [shape: f32[4,2,64,64], index: 4, kind: input, shape index: {}]   ;;  %s4691_s5 = inlined_call_operand.vmem [shape: f32[4,2,64,1], index: 5, kind: input, shape index: {}]   ;;  %s4692_s6 = inlined_call_operand.vmem [shape: f32[4,4,64], index: 6, kind: input, shape index: {}]   ;;  %s4693_s7 = inlined_call_operand.vmem [shape: f32[4,4,1], index: 7, kind: input, shape index: {}]   ;;  %s4694_s8 = inlined_call_operand.hbm [shape: f32[1,128], index: 8, kind: output, shape index: {}]  }
   0x1   :  { %v2802_v0 = vld [vmem:[%s4688_s2 + $0xc8] sm:$0xff]  ;;  %3686 = vset.pattern.permute.xlu0 %v3765_v1  ;;  %3684 = vset.pattern.permute.xlu1 %v3766_v2  ;;  %v2803_v3 = vld [vmem:[%s4688_s2 + $0xd0] sm:$0xff]  ;;  %v2801_v4 = vld [vmem:[%s4688_s2 + $0xc0] sm:$0xff] }
   0x2   :  { %106 = vperm.xlu0 %3686, %v2802_v0   ;;  %56 = vperm.xlu1 %3684, %v2802_v0   ;;  %v2806_v5 = vld [vmem:[%s4688_s2 + $0xe8] sm:$0xff]  ;;  %v2808_v6 = vld [vmem:[%s4688_s2 + $0xf8] sm:$0xff] }
   0x6   :  { %110 = vperm.xlu0 %3686, %v2803_v3   ;;  %3685 = vset.pattern.permute.xlu1 %v3765_v1 }
   0x7   :  { %102 = vperm.xlu1 %3685, %v2801_v4  }
   0xa   :  { %122 = vperm.xlu0 %3686, %v2806_v5  }
   0xb   :  { %3687 = vset.pattern.permute.xlu1 %v3766_v2 }
   0xc   :  { %61 = vperm.xlu1 %3687, %v2803_v3  }
   0xd   :  { %13 = vsyncpa [#allocation3], 0  ;;  %v2804_v7 = vld [vmem:[%s4688_s2 + $0xd8] sm:$0xff]  ;;  %v2800_v8 = vld [vmem:[%s4687_s1 + $0x6] sm:$0x3]  ;;  %vm276_vm0 = vcmask 523264   ;;  %v89_v45 = vlaneseq }
   0xe   :  { %130 = vperm.xlu0 %3686, %v2808_v6   ;;  %v2810_v9 = vld [vmem:[%s4689_s3 + $0xc8] sm:$0xff]  ;;  %v2809_v10 = vld [vmem:[%s4689_s3 + $0xc0] sm:$0xff]  ;;  %v2807_v12 = vld [vmem:[%s4688_s2 + $0xf0] sm:$0xff]  ;;  %v33_v28 = vsub.f32 1.0, %v2800_v8  ;;  %vm3768_vm1 = vmmov 0   ;;  %vm711_vm2 = vcmask 1041408  }
   0xf   :  { %v2805_v11 = vld [vmem:[%s4688_s2 + $0xe0] sm:$0xff]  ;;  %v2815_v13 = vld [vmem:[%s4689_s3 + $0xf0] sm:$0xff]  ;;  %v2826_v15 = vld [vmem:[%s4691_s5 + $0x188] sm:$0xff]  ;;  %v90_v48 = vshrl.u32 %v89_v45, 7 }
  0x10   :  { %66 = vperm.xlu1 %3687, %v2804_v7   ;;  %v2811_v14 = vld [vmem:[%s4689_s3 + $0xd0] sm:$0xff]  ;;  %v2812_v16 = vld [vmem:[%s4689_s3 + $0xd8] sm:$0xff]  ;;  %v2830_v18 = vld [vmem:[%s4691_s5 + $0x1a8] sm:$0xff] }
  0x11   :  { %v2828_v17 = vld [vmem:[%s4691_s5 + $0x198] sm:$0xff]  ;;  %v2813_v20 = vld [vmem:[%s4689_s3 + $0xe0] sm:$0xff]  ;;  %v2850_v21 = vld [vmem:[%s4691_s5 + $0x1c8] sm:$0xff]  ;;  %v3950_v51 = vsub.s32 0, %v90_v48  ;;  %v3952_v52 = vsub.s32 1, %v90_v48 }
  0x12   :  { %3693 = vset.pattern.permute.xlu0 %v3766_v2  ;;  %v2832_v19 = vld [vmem:[%s4691_s5 + $0x1b8] sm:$0xff]  ;;  %v2814_v22 = vld [vmem:[%s4689_s3 + $0xe8] sm:$0xff]  ;;  %v2825_v26 = vld [vmem:[%s4691_s5 + $0x180] sm:$0xff] }
  0x13   :  { %36 = vperm.xlu0 %3693, %v2800_v8   ;;  %v2852_v23 = vld [vmem:[%s4691_s5 + $0x1d8] sm:$0xff]  ;;  %v2854_v25 = vld [vmem:[%s4691_s5 + $0x1e8] sm:$0xff]  ;;  %v2827_v29 = vld [vmem:[%s4691_s5 + $0x190] sm:$0xff] }
  0x14   :  { %3688 = vset.pattern.permute.xlu1 %v3765_v1  ;;  %v2816_v24 = vld [vmem:[%s4689_s3 + $0xf8] sm:$0xff]  ;;  %v2817_v30 = vld [vmem:[%s4690_s4 + $0x180] sm:$0xff]  ;;  %v2831_v32 = vld [vmem:[%s4691_s5 + $0x1b0] sm:$0xff] }
  0x15   :  { %114 = vperm.xlu1 %3688, %v2804_v7   ;;  %v2856_v27 = vld [vmem:[%s4691_s5 + $0x1f8] sm:$0xff]  ;;  %v2829_v31 = vld [vmem:[%s4691_s5 + $0x1a0] sm:$0xff]  ;;  %3218 = vmatprep.mubr.msk.f32.mxu0 %vm276_vm0, %v2817_v30  ;;  %v2851_v34 = vld [vmem:[%s4691_s5 + $0x1d0] sm:$0xff] }
  0x16   :  { %v2849_v33 = vld [vmem:[%s4691_s5 + $0x1c0] sm:$0xff]  ;;  %v2855_v36 = vld [vmem:[%s4691_s5 + $0x1f0] sm:$0xff]  ;;  %v2866_v37 = vld [vmem:[%s4693_s7 + $0xc] sm:$0xf] }
  0x17   :  { %51 = vperm.xlu0 %3693, %v2801_v4   ;;  %v2853_v35 = vld [vmem:[%s4691_s5 + $0x1e0] sm:$0xff]  ;;  %v2870_v39 = vld [vmem:[%s4688_s2 + $0x88] sm:$0xff] }
  0x18   :  { %v3937_v38 = vld [vmem:[%s4687_s1 + $0x4] sm:$0x3]  ;;  %v3948_v50 = vld [vmem:[%s4686_s0] sm:$0x3] }
  0x19   :  { %3689 = vset.pattern.permute.xlu1 %v3766_v2 }
  0x1a   :  { %169 = vperm.xlu1 %3689, %v2810_v9  }
  0x1b   :  { %164 = vperm.xlu0 %3693, %v2809_v10  }
  0x1e   :  { %71 = vperm.xlu1 %3689, %v2805_v11  }
  0x1f   :  { %76 = vperm.xlu0 %3693, %v2806_v5  }
  0x22   :  { %3690 = vset.pattern.permute.xlu1 %v3765_v1 }
  0x23   :  { %118 = vperm.xlu1 %3690, %v2805_v11   ;;  %81 = vperm.xlu0 %3693, %v2807_v12  }
  0x27   :  { %3691 = vset.pattern.permute.xlu1 %v3766_v2  ;;  %194 = vperm.xlu0 %3693, %v2815_v13  }
  0x28   :  { %174 = vperm.xlu1 %3691, %v2811_v14  }
  0x2b   :  { %243 = vperm.xlu0 %3693, %v2826_v15  }
  0x2c   :  { %179 = vperm.xlu1 %3691, %v2812_v16  }
  0x2f   :  { %253 = vperm.xlu0 %3693, %v2828_v17  }
  0x30   :  { %86 = vperm.xlu1 %3691, %v2808_v6  }
  0x33   :  { %263 = vperm.xlu0 %3693, %v2830_v18  }
  0x34   :  { %3692 = vset.pattern.permute.xlu1 %v3765_v1 }
  0x35   :  { %126 = vperm.xlu1 %3692, %v2807_v12  }
  0x37   :  { %273 = vperm.xlu0 %3693, %v2832_v19  }
  0x39   :  { %3694 = vset.pattern.permute.xlu1 %v3766_v2 }
  0x3a   :  { %184 = vperm.xlu1 %3694, %v2813_v20  }
  0x3b   :  { %439 = vperm.xlu0 %3693, %v2850_v21  }
  0x3e   :  { %189 = vperm.xlu1 %3694, %v2814_v22  }
  0x3f   :  { %449 = vperm.xlu0 %3693, %v2852_v23  }
  0x42   :  { %199 = vperm.xlu1 %3694, %v2816_v24  }
  0x43   :  { %459 = vperm.xlu0 %3693, %v2854_v25  }
  0x46   :  { %238 = vperm.xlu1 %3694, %v2825_v26  }
  0x47   :  { %469 = vperm.xlu0 %3693, %v2856_v27  }
  0x4a   :  { %248 = vperm.xlu1 %3694, %v2827_v29  }
  0x4b   :  { %694 = vperm.xlu0 %3693, %v33_v28  }
  0x4e   :  { %258 = vperm.xlu1 %3694, %v2829_v31  }
  0x4f   :  { %3695 = vset.pattern.permute.xlu0 %v3765_v1 }
  0x52   :  { %268 = vperm.xlu1 %3694, %v2831_v32  }
  0x56   :  { %434 = vperm.xlu1 %3694, %v2849_v33  }
  0x5a   :  { %444 = vperm.xlu1 %3694, %v2851_v34  }
  0x5e   :  { %454 = vperm.xlu1 %3694, %v2853_v35  }
  0x62   :  { %464 = vperm.xlu1 %3694, %v2855_v36  }
  0x66   :  { %615 = vperm.xlu1 %3694, %v2866_v37  }
  0x6a   :  { %725 = vperm.xlu1 %3694, %v3937_v38  }
  0x6e   :  { %745 = vperm.xlu1 %3694, %v2870_v39  }
  0x72   :  { %3696 = vset.pattern.permute.xlu1 %v3765_v1 }
  0x73   :  { %795 = vperm.xlu1 %3696, %v2870_v39  }
  0x77   :  { %3697 = vset.pattern.permute.xlu1 %v3766_v2 }
  0x81   :  { %v57_v40 = vpop.permute.xlu1 %56  ;;  %v107_v41 = vpop.permute.xlu0 %106 }
  0x85   :  { %v111_v42 = vpop.permute.xlu0 %110 }
  0x86   :  { %v103_v43 = vpop.permute.xlu1 %102 }
  0x89   :  { %v123_v44 = vpop.permute.xlu0 %122 }
  0x8b   :  { %v62_v46 = vpop.permute.xlu1 %61 }
  0x8d   :  { %v131_v47 = vpop.permute.xlu0 %130 }
  0x8f   :  { %v67_v49 = vpop.permute.xlu1 %66 }
  0x92   :  { %v37_v53 = vpop.permute.xlu0 %36 }
  0x93   :  { %v3955_v54 = vmul.f32 %v37_v53, %v3948_v50 }
  0x94   :  { %v115_v55 = vpop.permute.xlu1 %114 }
  0x95   :  { %v92_v56 = vrot.slane %v3955_v54, %v3950_v51  ;;  %v136_v57 = vrot.slane %v3955_v54, %v3952_v52 }
  0x96   :  { %v52_v58 = vpop.permute.xlu0 %51 }
  0x97   :  { %v93_v59 = vmul.f32 %v92_v56, %v52_v58  ;;  %v94_v60 = vmul.f32 %v92_v56, %v57_v40  ;;  %v138_v61 = vmul.f32 %v136_v57, %v107_v41  ;;  %v137_v62 = vmul.f32 %v136_v57, %v103_v43 }
  0x98   :  { %v95_v12 = vmul.f32 %v92_v56, %v62_v46  ;;  %v139_v13 = vmul.f32 %v136_v57, %v111_v42  ;;  %v140_v14 = vmul.f32 %v136_v57, %v115_v55  ;;  %v96_v15 = vmul.f32 %v92_v56, %v67_v49 }
  0x99   :  { %v170_v63 = vpop.permute.xlu1 %169  ;;  %v146_v0 = vadd.f32 %v138_v61, %v94_v60  ;;  %v145_v4 = vadd.f32 %v137_v62, %v93_v59  ;;  %v142_v36 = vmul.f32 %v136_v57, %v123_v44  ;;  %v144_v45 = vmul.f32 %v136_v57, %v131_v47  ;;  %v2819_v47 = vld [vmem:[%s4690_s4 + $0x190] sm:$0xff] }
  0x9a   :  { %v165_v3 = vpop.permute.xlu0 %164  ;;  %v147_v17 = vadd.f32 %v139_v13, %v95_v12  ;;  %v148_v19 = vadd.f32 %v140_v14, %v96_v15 }
  0x9b   :  { %v203_v5 = vadd.f32 %v170_v63, %v146_v0  ;;  %v202_v6 = vadd.f32 %v165_v3, %v145_v4  ;;  %v2821_v63 = vld [vmem:[%s4690_s4 + $0x1a0] sm:$0xff]  ;;  %v2822_v0 = vld [vmem:[%s4690_s4 + $0x1a8] sm:$0xff]  ;;  %v2823_v3 = vld [vmem:[%s4690_s4 + $0x1b0] sm:$0xff] }
  0x9c   :  { %v2824_v4 = vld [vmem:[%s4690_s4 + $0x1b8] sm:$0xff] }
  0x9d   :  { %v211_v7 = vmax.f32 %v203_v5, 0.0  ;;  %v72_v8 = vpop.permute.xlu1 %71  ;;  %v210_v9 = vmax.f32 %v202_v6, 0.0  ;;  %v2841_v5 = vld [vmem:[%s4690_s4 + $0x1c0] sm:$0xff] }
  0x9e   :  { %v77_v26 = vpop.permute.xlu0 %76  ;;  %v97_v29 = vmul.f32 %v92_v56, %v72_v8  ;;  %3246 = vmatprep.mubr.msk.f32.mxu1 %vm276_vm0, %v2841_v5  ;;  %v2876_v5 = vld [vmem:[%s4688_s2 + $0xb8] sm:$0xff] }
  0x9f   :  { %v3502_v10 = vpack.c.bf16 %v211_v7, %v210_v9  ;;  %v98_v30 = vmul.f32 %v92_v56, %v77_v26 }
  0xa1   :  { %3503 = vmatprep.subr.bf16.mxu0 %v3502_v10  ;;  %v150_v41 = vadd.f32 %v142_v36, %v98_v30 }
  0xa2   :  { %v119_v11 = vpop.permute.xlu1 %118  ;;  %3505 = vmatpush3.bf16.msra.mxu0 %v3502_v10  ;;  %v82_v32 = vpop.permute.xlu0 %81 }
  0xa3   :  { %v141_v28 = vmul.f32 %v136_v57, %v119_v11  ;;  %v99_v34 = vmul.f32 %v92_v56, %v82_v32 }
  0xa5   :  { %v149_v35 = vadd.f32 %v141_v28, %v97_v29 }
  0xa6   :  { %v195_v46 = vpop.permute.xlu0 %194 }
  0xa7   :  { %v175_v16 = vpop.permute.xlu1 %174 }
  0xa8   :  { %v204_v18 = vadd.f32 %v175_v16, %v147_v17 }
  0xaa   :  { %v212_v22 = vmax.f32 %v204_v18, 0.0  ;;  %v244_v6 = vpop.permute.xlu0 %243 }
  0xab   :  { %v180_v20 = vpop.permute.xlu1 %179 }
  0xac   :  { %v205_v21 = vadd.f32 %v180_v20, %v148_v19 }
  0xae   :  { %v213_v23 = vmax.f32 %v205_v21, 0.0  ;;  %v254_v8 = vpop.permute.xlu0 %253 }
  0xaf   :  { %v87_v24 = vpop.permute.xlu1 %86 }
  0xb0   :  { %v3506_v25 = vpack.c.bf16 %v213_v23, %v212_v22  ;;  %v100_v37 = vmul.f32 %v92_v56, %v87_v24  ;;  %v2818_v56 = vld [vmem:[%s4690_s4 + $0x188] sm:$0xff] }
  0xb2   :  { %3507 = vmatprep.subr.bf16.mxu0 %v3506_v25  ;;  %v152_v55 = vadd.f32 %v144_v45, %v100_v37  ;;  %v264_v19 = vpop.permute.xlu0 %263  ;;  %v2843_v45 = vld [vmem:[%s4690_s4 + $0x1d0] sm:$0xff] }
  0xb3   :  { %3509 = vmatpush3.bf16.msra.mxu0 %v3506_v25 }
  0xb4   :  { %v127_v27 = vpop.permute.xlu1 %126 }
  0xb5   :  { %v143_v31 = vmul.f32 %v136_v57, %v127_v27  ;;  %v2820_v57 = vld [vmem:[%s4690_s4 + $0x198] sm:$0xff] }
  0xb7   :  { %v151_v39 = vadd.f32 %v143_v31, %v99_v34  ;;  %v274_v31 = vpop.permute.xlu0 %273 }
  0xb9   :  { %v185_v33 = vpop.permute.xlu1 %184  ;;  %v208_v48 = vadd.f32 %v195_v46, %v151_v39  ;;  %v2844_v46 = vld [vmem:[%s4690_s4 + $0x1d8] sm:$0xff] }
  0xba   :  { %v206_v40 = vadd.f32 %v185_v33, %v149_v35 }
  0xbb   :  { %v216_v62 = vmax.f32 %v208_v48, 0.0  ;;  %v2845_v48 = vld [vmem:[%s4690_s4 + $0x1e0] sm:$0xff] }
  0xbc   :  { %v214_v49 = vmax.f32 %v206_v40, 0.0 }
  0xbd   :  { %v190_v42 = vpop.permute.xlu1 %189 }
  0xbe   :  { %v207_v43 = vadd.f32 %v190_v42, %v150_v41 }
  0xc0   :  { %v215_v53 = vmax.f32 %v207_v43, 0.0  ;;  %v2842_v43 = vld [vmem:[%s4690_s4 + $0x1c8] sm:$0xff] }
  0xc1   :  { %v200_v58 = vpop.permute.xlu1 %199 }
  0xc2   :  { %v209_v59 = vadd.f32 %v200_v58, %v152_v55  ;;  %v3510_v60 = vpack.c.bf16 %v215_v53, %v214_v49  ;;  %v2846_v49 = vld [vmem:[%s4690_s4 + $0x1e8] sm:$0xff]  ;;  %v2847_v53 = vld [vmem:[%s4690_s4 + $0x1f0] sm:$0xff]  ;;  %v2848_v55 = vld [vmem:[%s4690_s4 + $0x1f8] sm:$0xff]  ;;  %v3767_v58 = vmov 0.0|0.0  }
  0xc4   :  { %v217_v61 = vmax.f32 %v209_v59, 0.0  ;;  %3511 = vmatprep.subr.bf16.mxu0 %v3510_v60  ;;  %v3769_v59 = vmov 0.0  }
  0xc5   :  { %3513 = vmatpush3.bf16.msra.mxu0 %v3510_v60  ;;  %v239_v7 = vpop.permute.xlu1 %238  ;;  %v2871_v60 = vld [vmem:[%s4688_s2 + $0x90] sm:$0xff] }
  0xc6   :  { %v3514_v44 = vpack.c.bf16 %v217_v61, %v216_v62  ;;  %v2869_v61 = vld [vmem:[%s4688_s2 + $0x80] sm:$0xff]  ;;  %750 = vperm.xlu1 %3697, %v2871_v60  }
  0xc7   :  { %791 = vperm.xlu0 %3695, %v2869_v61   ;;  %v2873_v62 = vld [vmem:[%s4688_s2 + $0xa0] sm:$0xff] }
  0xc8   :  { %3515 = vmatprep.subr.bf16.mxu0 %v3514_v44 }
  0xc9   :  { %3517 = vmatpush3.bf16.msra.mxu0 %v3514_v44  ;;  %v249_v10 = vpop.permute.xlu1 %248  ;;  %v2875_v44 = vld [vmem:[%s4688_s2 + $0xb0] sm:$0xff] }
  0xca   :  { %3534 = vmatprep.subr.bf16.mxu0 %v3767_v58  ;;  %3698 = vset.pattern.permute.xlu1 %v3765_v1 }
  0xcb   :  { %807 = vperm.xlu0 %3695, %v2873_v62   ;;  %799 = vperm.xlu1 %3698, %v2871_v60  }
  0xcc   :  { %3219 = vmatmul.mubr.msk.f32.vlgmr.msra.gmra.mrb[0].mxu0 %vm276_vm0, %v2818_v56  ;;  %v2872_v56 = vld [vmem:[%s4688_s2 + $0x98] sm:$0xff] }
  0xcd   :  { %3221 = vmatprep.mubr.msk.f32.mxu0 %vm276_vm0, %v2819_v47  ;;  %v259_v22 = vpop.permute.xlu1 %258  ;;  %v2878_v47 = vld [vmem:[%s4689_s3 + $0x88] sm:$0xff] }
  0xcf   :  { %815 = vperm.xlu0 %3695, %v2875_v44   ;;  %803 = vperm.xlu1 %3698, %v2872_v56  }
  0xd0   :  { %3222 = vmatmul.mubr.msk.f32.gmra.mrb[2].mxu0 %vm276_vm0, %v2820_v57  ;;  %v2874_v57 = vld [vmem:[%s4688_s2 + $0xa8] sm:$0xff] }
  0xd1   :  { %3224 = vmatprep.mubr.msk.f32.mxu0 %vm276_vm0, %v2821_v63  ;;  %v269_v34 = vpop.permute.xlu1 %268  ;;  %v2877_v63 = vld [vmem:[%s4689_s3 + $0x80] sm:$0xff] }
  0xd3   :  { %3702 = vset.pattern.permute.xlu0 %v3766_v2  ;;  %3699 = vset.pattern.permute.xlu1 %v3766_v2 }
  0xd4   :  { %3225 = vmatmul.mubr.msk.f32.gmra.mrb[4].mxu0 %vm276_vm0, %v2822_v0  ;;  %740 = vperm.xlu0 %3702, %v2869_v61   ;;  %v2879_v0 = vld [vmem:[%s4689_s3 + $0x90] sm:$0xff] }
  0xd5   :  { %3227 = vmatprep.mubr.msk.f32.mxu0 %vm276_vm0, %v2823_v3  ;;  %858 = vperm.xlu1 %3699, %v2878_v47   ;;  %v2880_v3 = vld [vmem:[%s4689_s3 + $0x98] sm:$0xff] }
  0xd8   :  { %3228 = vmatmul.mubr.msk.f32.gmra.mrb[6].mxu0 %vm276_vm0, %v2824_v4  ;;  %755 = vperm.xlu0 %3702, %v2872_v56   ;;  %v2882_v4 = vld [vmem:[%s4689_s3 + $0xa8] sm:$0xff] }
  0xd9   :  { %3274 = vmatprep.mubr.msk.f32.mxu0 %vm3768_vm1, %v3769_v59  ;;  %765 = vperm.xlu1 %3699, %v2874_v57  }
  0xdc   :  { %853 = vperm.xlu0 %3702, %v2877_v63  }
  0xdd   :  { %3700 = vset.pattern.permute.xlu1 %v3765_v1 }
  0xde   :  { %811 = vperm.xlu1 %3700, %v2874_v57  }
  0xe0   :  { %760 = vperm.xlu0 %3702, %v2873_v62  }
  0xe2   :  { %3701 = vset.pattern.permute.xlu1 %v3766_v2 }
  0xe3   :  { %863 = vperm.xlu1 %3701, %v2879_v0  }
  0xe4   :  { %868 = vperm.xlu0 %3702, %v2880_v3  }
  0xe7   :  { %770 = vperm.xlu1 %3701, %v2875_v44  }
  0xe8   :  { %878 = vperm.xlu0 %3702, %v2882_v4  }
  0xeb   :  { %775 = vperm.xlu1 %3701, %v2876_v5  }
  0xef   :  { %3703 = vset.pattern.permute.xlu1 %v3765_v1 }
  0xf0   :  { %819 = vperm.xlu1 %3703, %v2876_v5  }
  0xf4   :  { %3704 = vset.pattern.permute.xlu1 %v3766_v2 }
 0x19f   :  { %v3220_v9 = vpop.f32.mrb[0].mxu0 }
 0x1a0   :  { %v373_v11 = vadd.f32 %v3220_v9, %v244_v6  ;;  %v367_v12 = vpop.f32.mrb[1].mxu0  ;;  %v2893_v6 = vld [vmem:[%s4691_s5 + $0x100] sm:$0xff] }
 0x1a1   :  { %v368_v13 = vadd.f32 %v367_v12, %v239_v7  ;;  %927 = vperm.xlu0 %3702, %v2893_v6   ;;  %v2895_v7 = vld [vmem:[%s4691_s5 + $0x110] sm:$0xff]  ;;  %v2881_v9 = vld [vmem:[%s4689_s3 + $0xa0] sm:$0xff] }
 0x1a2   :  { %v407_v14 = vmax.f32 %v373_v11, 0.0  ;;  %873 = vperm.xlu1 %3704, %v2881_v9   ;;  %v2883_v11 = vld [vmem:[%s4689_s3 + $0xb0] sm:$0xff]  ;;  %v2917_v12 = vld [vmem:[%s4691_s5 + $0x140] sm:$0xff] }
 0x1a3   :  { %v406_v15 = vmax.f32 %v368_v13, 0.0  ;;  %v3223_v16 = vpop.f32.mrb[2].mxu0  ;;  %v2884_v13 = vld [vmem:[%s4689_s3 + $0xb8] sm:$0xff]  ;;  %v2885_v9 = vld [vmem:[%s4690_s4 + $0x100] sm:$0xff] }
 0x1a4   :  { %v383_v17 = vadd.f32 %v3223_v16, %v254_v8  ;;  %v377_v18 = vpop.f32.mrb[3].mxu0  ;;  %v2897_v8 = vld [vmem:[%s4691_s5 + $0x120] sm:$0xff] }
 0x1a5   :  { %v378_v20 = vadd.f32 %v377_v18, %v249_v10  ;;  %v3518_v21 = vpack.c.bf16 %v407_v14, %v406_v15  ;;  %937 = vperm.xlu0 %3702, %v2895_v7   ;;  %v2899_v10 = vld [vmem:[%s4691_s5 + $0x130] sm:$0xff]  ;;  %v2894_v15 = vld [vmem:[%s4691_s5 + $0x108] sm:$0xff]  ;;  %v2921_v16 = vld [vmem:[%s4691_s5 + $0x160] sm:$0xff] }
 0x1a6   :  { %v409_v23 = vmax.f32 %v383_v17, 0.0  ;;  %883 = vperm.xlu1 %3704, %v2883_v11   ;;  %v2919_v14 = vld [vmem:[%s4691_s5 + $0x150] sm:$0xff]  ;;  %v2896_v17 = vld [vmem:[%s4691_s5 + $0x118] sm:$0xff] }
 0x1a7   :  { %v408_v24 = vmax.f32 %v378_v20, 0.0  ;;  %v3226_v25 = vpop.f32.mrb[4].mxu0  ;;  %3519 = vmatprep.subr.bf16.mxu1 %v3518_v21  ;;  %v2923_v18 = vld [vmem:[%s4691_s5 + $0x170] sm:$0xff]  ;;  %v2934_v20 = vld [vmem:[%s4693_s7 + $0x8] sm:$0xf] }
 0x1a8   :  { %v393_v26 = vadd.f32 %v3226_v25, %v264_v19  ;;  %v387_v27 = vpop.f32.mrb[5].mxu0  ;;  %3521 = vmatpush3.bf16.msra.mxu1 %v3518_v21  ;;  %v2898_v19 = vld [vmem:[%s4691_s5 + $0x128] sm:$0xff]  ;;  %v2900_v21 = vld [vmem:[%s4691_s5 + $0x138] sm:$0xff] }
 0x1a9   :  { %v3522_v28 = vpack.c.bf16 %v409_v23, %v408_v24  ;;  %v388_v29 = vadd.f32 %v387_v27, %v259_v22  ;;  %947 = vperm.xlu0 %3702, %v2897_v8   ;;  %v2918_v22 = vld [vmem:[%s4691_s5 + $0x148] sm:$0xff]  ;;  %v2920_v23 = vld [vmem:[%s4691_s5 + $0x158] sm:$0xff]  ;;  %v2937_v27 = vld [vmem:[%s4688_s2 + $0x40] sm:$0xff] }
 0x1aa   :  { %v411_v30 = vmax.f32 %v393_v26, 0.0  ;;  %888 = vperm.xlu1 %3704, %v2884_v13   ;;  %v2922_v24 = vld [vmem:[%s4691_s5 + $0x168] sm:$0xff]  ;;  %v2924_v25 = vld [vmem:[%s4691_s5 + $0x178] sm:$0xff]  ;;  %v722_v26 = vsub.f32 1.0, %v3937_v38 }
 0x1ab   :  { %v410_v32 = vmax.f32 %v388_v29, 0.0  ;;  %v3229_v33 = vpop.f32.mrb[6].mxu0  ;;  %3523 = vmatprep.subr.bf16.mxu1 %v3522_v28  ;;  %v435_v29 = vpop.permute.xlu1 %434  ;;  %v2865_v8 = vld [vmem:[%s4692_s6 + $0xc] sm:$0xf] }
 0x1ac   :  { %v403_v35 = vadd.f32 %v3229_v33, %v274_v31  ;;  %v397_v36 = vpop.f32.mrb[7].mxu0  ;;  %3525 = vmatpush3.bf16.msra.mxu1 %v3522_v28  ;;  %v440_v28 = vpop.permute.xlu0 %439 }
 0x1ad   :  { %v3526_v37 = vpack.c.bf16 %v411_v30, %v410_v32  ;;  %v398_v39 = vadd.f32 %v397_v36, %v269_v34  ;;  %957 = vperm.xlu0 %3702, %v2899_v10  }
 0x1ae   :  { %v413_v40 = vmax.f32 %v403_v35, 0.0  ;;  %932 = vperm.xlu1 %3704, %v2894_v15  }
 0x1af   :  { %v412_v41 = vmax.f32 %v398_v39, 0.0  ;;  %3527 = vmatprep.subr.bf16.mxu1 %v3526_v37  ;;  %v445_v32 = vpop.permute.xlu1 %444 }
 0x1b0   :  { %3529 = vmatpush3.bf16.msra.mxu1 %v3526_v37  ;;  %v450_v30 = vpop.permute.xlu0 %449 }
 0x1b1   :  { %v3530_v42 = vpack.c.bf16 %v413_v40, %v412_v41  ;;  %1122 = vperm.xlu0 %3702, %v2917_v12  }
 0x1b2   :  { %942 = vperm.xlu1 %3704, %v2896_v17  }
 0x1b3   :  { %3531 = vmatprep.subr.bf16.mxu1 %v3530_v42 }
 0x1b4   :  { %3533 = vmatpush3.bf16.msra.mxu1 %v3530_v42  ;;  %v460_v41 = vpop.permute.xlu0 %459 }
 0x1b5   :  { %1132 = vperm.xlu0 %3702, %v2919_v14  }
 0x1b6   :  { %952 = vperm.xlu1 %3704, %v2898_v19  }
 0x1b7   :  { %3247 = vmatmul.mubr.msk.f32.vlgmr.msra.gmra.mrb[0].mxu1 %vm276_vm0, %v2842_v43 }
 0x1b8   :  { %3249 = vmatprep.mubr.msk.f32.mxu1 %vm276_vm0, %v2843_v45  ;;  %v455_v45 = vpop.permute.xlu1 %454  ;;  %v470_v44 = vpop.permute.xlu0 %469 }
 0x1b9   :  { %1142 = vperm.xlu0 %3702, %v2921_v16  }
 0x1ba   :  { %962 = vperm.xlu1 %3704, %v2900_v21  }
 0x1bb   :  { %3250 = vmatmul.mubr.msk.f32.gmra.mrb[2].mxu1 %vm276_vm0, %v2844_v46 }
 0x1bc   :  { %3252 = vmatprep.mubr.msk.f32.mxu1 %vm276_vm0, %v2845_v48  ;;  %v465_v57 = vpop.permute.xlu1 %464 }
 0x1bd   :  { %1152 = vperm.xlu0 %3702, %v2923_v18   ;;  %v695_v18 = vpop.permute.xlu0 %694 }
 0x1be   :  { %1127 = vperm.xlu1 %3704, %v2918_v22  }
 0x1bf   :  { %3253 = vmatmul.mubr.msk.f32.gmra.mrb[4].mxu1 %vm276_vm0, %v2846_v49 }
 0x1c0   :  { %3255 = vmatprep.mubr.msk.f32.mxu1 %vm276_vm0, %v2847_v53  ;;  %v616_v10 = vpop.permute.xlu1 %615 }
 0x1c1   :  { %1303 = vperm.xlu0 %3702, %v2934_v20   ;;  %v792_v19 = vpop.permute.xlu0 %791 }
 0x1c2   :  { %1137 = vperm.xlu1 %3704, %v2920_v23  }
 0x1c3   :  { %3256 = vmatmul.mubr.msk.f32.gmra.mrb[6].mxu1 %vm276_vm0, %v2848_v55 }
 0x1c4   :  { %3293 = vmatprep.mubr.msk.f32.mxu1 %vm276_vm0, %v2885_v9  ;;  %v726_v11 = vpop.permute.xlu1 %725 }
 0x1c5   :  { %3706 = vset.pattern.permute.xlu0 %v3765_v1 }
 0x1c6   :  { %1147 = vperm.xlu1 %3704, %v2922_v24   ;;  %v808_v24 = vpop.permute.xlu0 %807 }
 0x1c8   :  { %v746_v12 = vpop.permute.xlu1 %745 }
 0x1ca   :  { %1157 = vperm.xlu1 %3704, %v2924_v25  }
 0x1cc   :  { %v796_v13 = vpop.permute.xlu1 %795 }
 0x1ce   :  { %1382 = vperm.xlu1 %3704, %v722_v26   ;;  %v816_v26 = vpop.permute.xlu0 %815 }
 0x1d0   :  { %v751_v14 = vpop.permute.xlu1 %750 }
 0x1d2   :  { %1427 = vperm.xlu1 %3704, %v2937_v27  }
 0x1d4   :  { %v800_v15 = vpop.permute.xlu1 %799 }
 0x1d6   :  { %3705 = vset.pattern.permute.xlu1 %v3765_v1 }
 0x1d7   :  { %1478 = vperm.xlu1 %3705, %v2937_v27  }
 0x1d8   :  { %v804_v16 = vpop.permute.xlu1 %803 }
 0x1db   :  { %3707 = vset.pattern.permute.xlu1 %v3766_v2 }
 0x1dc   :  { %v859_v17 = vpop.permute.xlu1 %858 }
 0x1e0   :  { %v766_v21 = vpop.permute.xlu1 %765 }
 0x1e4   :  { %v812_v25 = vpop.permute.xlu1 %811 }
 0x28a   :  { %v3248_v31 = vpop.f32.mrb[0].mxu1 }
 0x28b   :  { %v568_v33 = vadd.f32 %v3248_v31, %v440_v28  ;;  %v562_v34 = vpop.f32.mrb[1].mxu1  ;;  %v864_v28 = vpop.permute.xlu1 %863 }
 0x28c   :  { %v563_v38 = vadd.f32 %v562_v34, %v435_v29 }
 0x28d   :  { %v602_v35 = vmax.f32 %v568_v33, 0.0  ;;  %v741_v33 = vpop.permute.xlu0 %740 }
 0x28e   :  { %v601_v36 = vmax.f32 %v563_v38, 0.0  ;;  %v3251_v37 = vpop.f32.mrb[2].mxu1 }
 0x28f   :  { %v578_v39 = vadd.f32 %v3251_v37, %v450_v30  ;;  %v572_v40 = vpop.f32.mrb[3].mxu1  ;;  %v698_v30 = vrot.slane %v695_v18, 6  ;;  %v771_v38 = vpop.permute.xlu1 %770 }
 0x290   :  { %v3535_v42 = vpack.c.bf16 %v602_v35, %v601_v36  ;;  %v573_v43 = vadd.f32 %v572_v40, %v445_v32 }
 0x291   :  { %v604_v46 = vmax.f32 %v578_v39, 0.0  ;;  %v756_v36 = vpop.permute.xlu0 %755 }
 0x292   :  { %v603_v48 = vmax.f32 %v573_v43, 0.0  ;;  %v3254_v49 = vpop.f32.mrb[4].mxu1  ;;  %3536 = vmatpush3.bf16.msra.mxu0 %v3535_v42 }
 0x293   :  { %v588_v53 = vadd.f32 %v3254_v49, %v460_v41  ;;  %v582_v55 = vpop.f32.mrb[5].mxu1  ;;  %3537 = vmatprep.subr.bf16.mxu0 %v3767_v58  ;;  %v776_v37 = vpop.permute.xlu1 %775 }
 0x294   :  { %v3538_v60 = vpack.c.bf16 %v604_v46, %v603_v48  ;;  %v583_v61 = vadd.f32 %v582_v55, %v455_v45 }
 0x295   :  { %v606_v62 = vmax.f32 %v588_v53, 0.0  ;;  %v854_v42 = vpop.permute.xlu0 %853 }
 0x296   :  { %v605_v56 = vmax.f32 %v583_v61, 0.0  ;;  %v3257_v47 = vpop.f32.mrb[6].mxu1  ;;  %3539 = vmatpush3.bf16.msra.mxu0 %v3538_v60 }
 0x297   :  { %v598_v63 = vadd.f32 %v3257_v47, %v470_v44  ;;  %v592_v0 = vpop.f32.mrb[7].mxu1  ;;  %3540 = vmatprep.subr.bf16.mxu0 %v3767_v58  ;;  %v820_v43 = vpop.permute.xlu1 %819 }
 0x298   :  { %v3541_v3 = vpack.c.bf16 %v606_v62, %v605_v56  ;;  %v593_v4 = vadd.f32 %v592_v0, %v465_v57 }
 0x299   :  { %v608_v5 = vmax.f32 %v598_v63, 0.0  ;;  %v761_v49 = vpop.permute.xlu0 %760 }
 0x29a   :  { %v607_v6 = vmax.f32 %v593_v4, 0.0  ;;  %3542 = vmatpush3.bf16.msra.mxu0 %v3541_v3 }
 0x29b   :  { %3543 = vmatprep.subr.bf16.mxu0 %v3767_v58  ;;  %v874_v53 = vpop.permute.xlu1 %873 }
 0x29c   :  { %v3544_v7 = vpack.c.bf16 %v608_v5, %v607_v6 }
 0x29d   :  { %v869_v3 = vpop.permute.xlu0 %868 }
 0x29e   :  { %3545 = vmatpush3.bf16.msra.mxu0 %v3544_v7 }
 0x2a1   :  { %3275 = vmatmul.mubr.msk.f32.vlgmr.msra.gmra.mrb[8].mxu0 %vm276_vm0, %v2865_v8  ;;  %v884_v8 = vpop.permute.xlu1 %883 }
 0x374   :  { %v687_v20 = vpop.f32.mrb[8].mxu0 }
 0x375   :  { %v688_v22 = vadd.f32 %v687_v20, %v616_v10  ;;  %v3276_v23 = vpop.f32.mrb[9].mxu0 }
 0x377   :  { %3725 = vtanh.f32 %v688_v22  ;;  %v700_v32 = vmul.f32 %v698_v30, %v688_v22 }
 0x379   :  { %v702_v35 = vrot.slane %v700_v32, 2 }
 0x37b   :  { %v704_v39 = vsub.f32 %v3948_v50, %v702_v35 }
 0x37d   :  { %v705_v40 = vmul.f32 %v704_v39, %v695_v18 }
 0x381   :  { %v3726_v27 = vpop.eup %3725 }
 0x382   :  { %v4145_v29 = vmul.f32 %v3726_v27, %v695_v18 }
 0x384   :  { %v706_v31 = vsub.f32 0.0, %v4145_v29 }
 0x386   :  { %v707_v34 = vmul.f32 1.442695, %v706_v31 }
 0x388   :  { %3727 = vpow2.f32 %v707_v34 }
 0x392   :  { %v3728_v41 = vpop.eup %3727 }
 0x393   :  { %v709_v45 = vmul.f32 %v3728_v41, %v705_v40 }
 0x395   :  { %v4150_v46 = vadd.f32 %v709_v45, %v3955_v54  ;;  %v2888_v45 = vld [vmem:[%s4690_s4 + $0x118] sm:$0xff] }
 0x397   :  { %v4153_v48 = vmul.f32 %v726_v11, %v4150_v46 }
 0x399   :  { %v781_v55 = vrot.slane %v4153_v48, %v3950_v51  ;;  %v825_v60 = vrot.slane %v4153_v48, %v3952_v52 }
 0x39b   :  { %v788_v50 = vmul.f32 %v781_v55, %v771_v38  ;;  %v832_v61 = vmul.f32 %v825_v60, %v816_v26  ;;  %v782_v62 = vmul.f32 %v781_v55, %v741_v33  ;;  %v783_v44 = vmul.f32 %v781_v55, %v746_v12  ;;  %v879_v33 = vpop.permute.xlu0 %878  ;;  %v889_v38 = vpop.permute.xlu1 %888 }
 0x39c   :  { %v826_v56 = vmul.f32 %v825_v60, %v792_v19  ;;  %v827_v47 = vmul.f32 %v825_v60, %v796_v13  ;;  %v789_v57 = vmul.f32 %v781_v55, %v776_v37  ;;  %v833_v54 = vmul.f32 %v825_v60, %v820_v43  ;;  %v2887_v43 = vld [vmem:[%s4690_s4 + $0x110] sm:$0xff] }
 0x39d   :  { %v784_v63 = vmul.f32 %v781_v55, %v751_v14  ;;  %v785_v0 = vmul.f32 %v781_v55, %v756_v36  ;;  %v828_v6 = vmul.f32 %v825_v60, %v800_v15  ;;  %v829_v7 = vmul.f32 %v825_v60, %v804_v16 }
 0x39e   :  { %v834_v4 = vadd.f32 %v826_v56, %v782_v62  ;;  %v835_v5 = vadd.f32 %v827_v47, %v783_v44  ;;  %v786_v9 = vmul.f32 %v781_v55, %v761_v49  ;;  %v787_v10 = vmul.f32 %v781_v55, %v766_v21  ;;  %v2889_v49 = vld [vmem:[%s4690_s4 + $0x120] sm:$0xff]  ;;  %v2891_v55 = vld [vmem:[%s4690_s4 + $0x130] sm:$0xff] }
 0x39f   :  { %v836_v20 = vadd.f32 %v828_v6, %v784_v63  ;;  %v837_v22 = vadd.f32 %v829_v7, %v785_v0  ;;  %v840_v23 = vadd.f32 %v832_v61, %v788_v50  ;;  %v841_v12 = vadd.f32 %v833_v54, %v789_v57  ;;  %v2909_v50 = vld [vmem:[%s4690_s4 + $0x140] sm:$0xff]  ;;  %v933_v61 = vpop.permute.xlu1 %932  ;;  %v928_v62 = vpop.permute.xlu0 %927 }
 0x3a0   :  { %v891_v11 = vadd.f32 %v854_v42, %v834_v4  ;;  %v892_v18 = vadd.f32 %v859_v17, %v835_v5  ;;  %v830_v19 = vmul.f32 %v825_v60, %v808_v24  ;;  %v831_v13 = vmul.f32 %v825_v60, %v812_v25  ;;  %v2886_v42 = vld [vmem:[%s4690_s4 + $0x108] sm:$0xff]  ;;  %v2892_v60 = vld [vmem:[%s4690_s4 + $0x138] sm:$0xff]  ;;  %3321 = vmatprep.mubr.msk.f32.mxu0 %vm276_vm0, %v2909_v50  ;;  %v2943_v50 = vld [vmem:[%s4688_s2 + $0x70] sm:$0xff] }
 0x3a1   :  { %v893_v14 = vadd.f32 %v864_v28, %v836_v20  ;;  %v894_v30 = vadd.f32 %v869_v3, %v837_v22  ;;  %v897_v17 = vadd.f32 %v884_v8, %v840_v23  ;;  %v898_v36 = vadd.f32 %v889_v38, %v841_v12 }
 0x3a2   :  { %v899_v26 = vmax.f32 %v891_v11, 0.0  ;;  %v900_v27 = vmax.f32 %v892_v18, 0.0  ;;  %v838_v31 = vadd.f32 %v830_v19, %v786_v9  ;;  %v839_v32 = vadd.f32 %v831_v13, %v787_v10 }
 0x3a3   :  { %v901_v16 = vmax.f32 %v893_v14, 0.0  ;;  %v902_v34 = vmax.f32 %v894_v30, 0.0  ;;  %v905_v39 = vmax.f32 %v897_v17, 0.0  ;;  %v906_v28 = vmax.f32 %v898_v36, 0.0  ;;  %v943_v44 = vpop.permute.xlu1 %942  ;;  %v938_v47 = vpop.permute.xlu0 %937  ;;  %v2912_v17 = vld [vmem:[%s4690_s4 + $0x158] sm:$0xff]  ;;  %v2913_v36 = vld [vmem:[%s4690_s4 + $0x160] sm:$0xff] }
 0x3a4   :  { %v3546_v15 = vpack.c.bf16 %v900_v27, %v899_v26  ;;  %v895_v21 = vadd.f32 %v874_v53, %v838_v31  ;;  %v896_v35 = vadd.f32 %v879_v33, %v839_v32  ;;  %v2890_v53 = vld [vmem:[%s4690_s4 + $0x128] sm:$0xff] }
 0x3a5   :  { %v3550_v37 = vpack.c.bf16 %v902_v34, %v901_v16  ;;  %v3558_v41 = vpack.c.bf16 %v906_v28, %v905_v39  ;;  %v2939_v39 = vld [vmem:[%s4688_s2 + $0x50] sm:$0xff]  ;;  %v2938_v28 = vld [vmem:[%s4688_s2 + $0x48] sm:$0xff] }
 0x3a6   :  { %3547 = vmatprep.subr.bf16.mxu1 %v3546_v15  ;;  %v903_v24 = vmax.f32 %v895_v21, 0.0  ;;  %v904_v25 = vmax.f32 %v896_v35, 0.0  ;;  %v2910_v21 = vld [vmem:[%s4690_s4 + $0x148] sm:$0xff]  ;;  %v2911_v35 = vld [vmem:[%s4690_s4 + $0x150] sm:$0xff]  ;;  %1437 = vperm.xlu1 %3707, %v2939_v39  }
 0x3a7   :  { %3549 = vmatpush3.bf16.msra.mxu1 %v3546_v15  ;;  %v953_v7 = vpop.permute.xlu1 %952  ;;  %v948_v10 = vpop.permute.xlu0 %947  ;;  %1482 = vperm.xlu0 %3706, %v2938_v28  }
 0x3a8   :  { %3551 = vmatprep.subr.bf16.mxu1 %v3550_v37  ;;  %v3554_v40 = vpack.c.bf16 %v904_v25, %v903_v24  ;;  %v2915_v24 = vld [vmem:[%s4690_s4 + $0x170] sm:$0xff]  ;;  %v2916_v25 = vld [vmem:[%s4690_s4 + $0x178] sm:$0xff] }
 0x3ab   :  { %3553 = vmatpush3.bf16.msra.mxu1 %v3550_v37  ;;  %v963_v26 = vpop.permute.xlu1 %962  ;;  %v958_v30 = vpop.permute.xlu0 %957  ;;  %v2914_v37 = vld [vmem:[%s4690_s4 + $0x168] sm:$0xff]  ;;  %1486 = vperm.xlu0 %3706, %v2939_v39  }
 0x3ac   :  { %3555 = vmatprep.subr.bf16.mxu1 %v3554_v40 }
 0x3af   :  { %3557 = vmatpush3.bf16.msra.mxu1 %v3554_v40  ;;  %v2940_v40 = vld [vmem:[%s4688_s2 + $0x58] sm:$0xff] }
 0x3b0   :  { %3559 = vmatprep.subr.bf16.mxu1 %v3558_v41  ;;  %1442 = vperm.xlu1 %3707, %v2940_v40  }
 0x3b3   :  { %3561 = vmatpush3.bf16.msra.mxu1 %v3558_v41  ;;  %v2942_v41 = vld [vmem:[%s4688_s2 + $0x68] sm:$0xff] }
 0x3b4   :  { %3578 = vmatprep.subr.bf16.mxu1 %v3767_v58  ;;  %3708 = vset.pattern.permute.xlu1 %v3765_v1 }
 0x3b5   :  { %1498 = vperm.xlu0 %3706, %v2942_v41   ;;  %1490 = vperm.xlu1 %3708, %v2940_v40  }
 0x3b6   :  { %3294 = vmatmul.mubr.msk.f32.vlgmr.msra.gmra.mrb[8].mxu1 %vm276_vm0, %v2886_v42  ;;  %v2944_v42 = vld [vmem:[%s4688_s2 + $0x78] sm:$0xff] }
 0x3b7   :  { %3296 = vmatprep.mubr.msk.f32.mxu1 %vm276_vm0, %v2887_v43  ;;  %v2946_v43 = vld [vmem:[%s4689_s3 + $0x48] sm:$0xff] }
 0x3b9   :  { %1506 = vperm.xlu0 %3706, %v2944_v42   ;;  %3709 = vset.pattern.permute.xlu1 %v3766_v2 }
 0x3ba   :  { %3297 = vmatmul.mubr.msk.f32.gmra.mrb[10].mxu1 %vm276_vm0, %v2888_v45  ;;  %1545 = vperm.xlu1 %3709, %v2946_v43   ;;  %v2936_v45 = vld [vmem:[%s4687_s1 + $0x2] sm:$0x3] }
 0x3bb   :  { %3299 = vmatprep.mubr.msk.f32.mxu1 %vm276_vm0, %v2889_v49  ;;  %v2941_v49 = vld [vmem:[%s4688_s2 + $0x60] sm:$0xff] }
 0x3bd   :  { %3713 = vset.pattern.permute.xlu0 %v3766_v2 }
 0x3be   :  { %3300 = vmatmul.mubr.msk.f32.gmra.mrb[12].mxu1 %vm276_vm0, %v2890_v53  ;;  %1412 = vperm.xlu0 %3713, %v2936_v45   ;;  %v2945_v53 = vld [vmem:[%s4689_s3 + $0x40] sm:$0xff] }
 0x3bf   :  { %3302 = vmatprep.mubr.msk.f32.mxu1 %vm276_vm0, %v2891_v55  ;;  %1447 = vperm.xlu1 %3709, %v2941_v49   ;;  %v2947_v55 = vld [vmem:[%s4689_s3 + $0x50] sm:$0xff] }
 0x3c2   :  { %3303 = vmatmul.mubr.msk.f32.gmra.mrb[14].mxu1 %vm276_vm0, %v2892_v60  ;;  %1432 = vperm.xlu0 %3713, %v2938_v28   ;;  %v2948_v60 = vld [vmem:[%s4689_s3 + $0x58] sm:$0xff] }
 0x3c3   :  { %3349 = vmatprep.mubr.msk.f32.mxu1 %vm3768_vm1, %v3769_v59  ;;  %3710 = vset.pattern.permute.xlu1 %v3765_v1 }
 0x3c4   :  { %1494 = vperm.xlu1 %3710, %v2941_v49  }
 0x3c6   :  { %1540 = vperm.xlu0 %3713, %v2945_v53  }
 0x3c8   :  { %3711 = vset.pattern.permute.xlu1 %v3766_v2 }
 0x3c9   :  { %1550 = vperm.xlu1 %3711, %v2947_v55  }
 0x3ca   :  { %1452 = vperm.xlu0 %3713, %v2942_v41  }
 0x3cd   :  { %1555 = vperm.xlu1 %3711, %v2948_v60  }
 0x3ce   :  { %1457 = vperm.xlu0 %3713, %v2943_v50  }
 0x3d1   :  { %1462 = vperm.xlu1 %3711, %v2944_v42  }
 0x3d5   :  { %3712 = vset.pattern.permute.xlu1 %v3765_v1 }
 0x3d6   :  { %1502 = vperm.xlu1 %3712, %v2943_v50  }
 0x3da   :  { %3714 = vset.pattern.permute.xlu1 %v3766_v2 }
 0x489   :  { %v3295_v56 = vpop.f32.mrb[8].mxu1 }
 0x48a   :  { %v1061_v57 = vadd.f32 %v3295_v56, %v933_v61  ;;  %v1055_v54 = vpop.f32.mrb[9].mxu1  ;;  %v2951_v61 = vld [vmem:[%s4689_s3 + $0x70] sm:$0xff]  ;;  %v2949_v56 = vld [vmem:[%s4689_s3 + $0x60] sm:$0xff] }
 0x48b   :  { %v1056_v63 = vadd.f32 %v1055_v54, %v928_v62  ;;  %1570 = vperm.xlu0 %3713, %v2951_v61   ;;  %v2962_v62 = vld [vmem:[%s4691_s5 + $0x88] sm:$0xff]  ;;  %1560 = vperm.xlu1 %3714, %v2949_v56   ;;  %v2968_v54 = vld [vmem:[%s4691_s5 + $0xb8] sm:$0xff] }
 0x48c   :  { %v1095_v0 = vmax.f32 %v1061_v57, 0.0  ;;  %v2950_v57 = vld [vmem:[%s4689_s3 + $0x68] sm:$0xff] }
 0x48d   :  { %v1094_v3 = vmax.f32 %v1056_v63, 0.0  ;;  %v3298_v4 = vpop.f32.mrb[10].mxu1  ;;  %v2952_v63 = vld [vmem:[%s4689_s3 + $0x78] sm:$0xff] }
 0x48e   :  { %v1071_v5 = vadd.f32 %v3298_v4, %v943_v44  ;;  %v1065_v6 = vpop.f32.mrb[11].mxu1  ;;  %v2964_v44 = vld [vmem:[%s4691_s5 + $0x98] sm:$0xff] }
 0x48f   :  { %v3562_v8 = vpack.c.bf16 %v1095_v0, %v1094_v3  ;;  %v1066_v9 = vadd.f32 %v1065_v6, %v938_v47  ;;  %1619 = vperm.xlu0 %3713, %v2962_v62   ;;  %v2966_v47 = vld [vmem:[%s4691_s5 + $0xa8] sm:$0xff]  ;;  %1565 = vperm.xlu1 %3714, %v2950_v57   ;;  %v2961_v3 = vld [vmem:[%s4691_s5 + $0x80] sm:$0xff]  ;;  %v2988_v4 = vld [vmem:[%s4691_s5 + $0xd8] sm:$0xff] }
 0x490   :  { %v1097_v11 = vmax.f32 %v1071_v5, 0.0  ;;  %v2986_v0 = vld [vmem:[%s4691_s5 + $0xc8] sm:$0xff]  ;;  %v2963_v5 = vld [vmem:[%s4691_s5 + $0x90] sm:$0xff] }
 0x491   :  { %v1096_v18 = vmax.f32 %v1066_v9, 0.0  ;;  %v3301_v20 = vpop.f32.mrb[12].mxu1  ;;  %3563 = vmatprep.subr.bf16.mxu0 %v3562_v8  ;;  %v2990_v6 = vld [vmem:[%s4691_s5 + $0xe8] sm:$0xff]  ;;  %v2967_v9 = vld [vmem:[%s4691_s5 + $0xb0] sm:$0xff] }
 0x492   :  { %v1081_v22 = vadd.f32 %v3301_v20, %v953_v7  ;;  %v1075_v23 = vpop.f32.mrb[13].mxu1  ;;  %3565 = vmatpush3.bf16.msra.mxu0 %v3562_v8  ;;  %v2965_v7 = vld [vmem:[%s4691_s5 + $0xa0] sm:$0xff]  ;;  %v2992_v8 = vld [vmem:[%s4691_s5 + $0xf8] sm:$0xff]  ;;  %v2933_v57 = vld [vmem:[%s4692_s6 + $0x8] sm:$0xf] }
 0x493   :  { %v3566_v12 = vpack.c.bf16 %v1097_v11, %v1096_v18  ;;  %v1076_v19 = vadd.f32 %v1075_v23, %v948_v10  ;;  %1629 = vperm.xlu0 %3713, %v2964_v44   ;;  %1575 = vperm.xlu1 %3714, %v2952_v63   ;;  %v1409_v10 = vsub.f32 1.0, %v2936_v45  ;;  %v2985_v11 = vld [vmem:[%s4691_s5 + $0xc0] sm:$0xff]  ;;  %v2987_v18 = vld [vmem:[%s4691_s5 + $0xd0] sm:$0xff] }
 0x494   :  { %v1099_v13 = vmax.f32 %v1081_v22, 0.0  ;;  %v2989_v20 = vld [vmem:[%s4691_s5 + $0xe0] sm:$0xff]  ;;  %v2991_v22 = vld [vmem:[%s4691_s5 + $0xf0] sm:$0xff] }
 0x495   :  { %v1098_v27 = vmax.f32 %v1076_v19, 0.0  ;;  %v3304_v14 = vpop.f32.mrb[14].mxu1  ;;  %3567 = vmatprep.subr.bf16.mxu0 %v3566_v12  ;;  %v3002_v23 = vld [vmem:[%s4693_s7 + $0x4] sm:$0xf]  ;;  %v2103_v19 = vld [vmem:[%s4688_s2 + $0x8] sm:$0xff] }
 0x496   :  { %v1091_v31 = vadd.f32 %v3304_v14, %v963_v26  ;;  %v1085_v32 = vpop.f32.mrb[15].mxu1  ;;  %3569 = vmatpush3.bf16.msra.mxu0 %v3566_v12  ;;  %v4332_v12 = vld [vmem:[%s4687_s1] sm:$0x3]  ;;  %v1123_v26 = vpop.permute.xlu0 %1122 }
 0x497   :  { %v3570_v33 = vpack.c.bf16 %v1099_v13, %v1098_v27  ;;  %v1086_v15 = vadd.f32 %v1085_v32, %v958_v30  ;;  %1639 = vperm.xlu0 %3713, %v2966_v47   ;;  %1614 = vperm.xlu1 %3714, %v2961_v3   ;;  %v1128_v13 = vpop.permute.xlu1 %1127 }
 0x498   :  { %v1101_v16 = vmax.f32 %v1091_v31, 0.0 }
 0x499   :  { %v1100_v34 = vmax.f32 %v1086_v15, 0.0  ;;  %3571 = vmatprep.subr.bf16.mxu0 %v3570_v33 }
 0x49a   :  { %3573 = vmatpush3.bf16.msra.mxu0 %v3570_v33  ;;  %v1133_v30 = vpop.permute.xlu0 %1132 }
 0x49b   :  { %v3574_v38 = vpack.c.bf16 %v1101_v16, %v1100_v34  ;;  %1649 = vperm.xlu0 %3713, %v2968_v54   ;;  %1624 = vperm.xlu1 %3714, %v2963_v5   ;;  %v1138_v27 = vpop.permute.xlu1 %1137  ;;  %v2953_v54 = vld [vmem:[%s4690_s4 + $0x80] sm:$0xff] }
 0x49d   :  { %3575 = vmatprep.subr.bf16.mxu0 %v3574_v38 }
 0x49e   :  { %3577 = vmatpush3.bf16.msra.mxu0 %v3574_v38 }
 0x49f   :  { %1814 = vperm.xlu0 %3713, %v2986_v0   ;;  %1634 = vperm.xlu1 %3714, %v2965_v7  }
 0x4a1   :  { %3322 = vmatmul.mubr.msk.f32.vlgmr.msra.gmra.mrb[10].mxu0 %vm276_vm0, %v2910_v21 }
 0x4a2   :  { %3324 = vmatprep.mubr.msk.f32.mxu0 %vm276_vm0, %v2911_v35  ;;  %v1148_v35 = vpop.permute.xlu1 %1147 }
 0x4a3   :  { %1824 = vperm.xlu0 %3713, %v2988_v4   ;;  %1644 = vperm.xlu1 %3714, %v2967_v9  }
 0x4a5   :  { %3325 = vmatmul.mubr.msk.f32.gmra.mrb[12].mxu0 %vm276_vm0, %v2912_v17 }
 0x4a6   :  { %3327 = vmatprep.mubr.msk.f32.mxu0 %vm276_vm0, %v2913_v36  ;;  %v1158_v45 = vpop.permute.xlu1 %1157 }
 0x4a7   :  { %1834 = vperm.xlu0 %3713, %v2990_v6   ;;  %1809 = vperm.xlu1 %3714, %v2985_v11  }
 0x4a9   :  { %3328 = vmatmul.mubr.msk.f32.gmra.mrb[14].mxu0 %vm276_vm0, %v2914_v37  ;;  %v1143_v37 = vpop.permute.xlu0 %1142 }
 0x4aa   :  { %3330 = vmatprep.mubr.msk.f32.mxu0 %vm276_vm0, %v2915_v24  ;;  %v1383_v63 = vpop.permute.xlu1 %1382 }
 0x4ab   :  { %1844 = vperm.xlu0 %3713, %v2992_v8   ;;  %1819 = vperm.xlu1 %3714, %v2987_v18  }
 0x4ad   :  { %3331 = vmatmul.mubr.msk.f32.gmra.mrb[16].mxu0 %vm276_vm0, %v2916_v25  ;;  %v1153_v55 = vpop.permute.xlu0 %1152 }
 0x4ae   :  { %3368 = vmatprep.mubr.msk.f32.mxu0 %vm276_vm0, %v2953_v54  ;;  %v1428_v0 = vpop.permute.xlu1 %1427 }
 0x4af   :  { %2069 = vperm.xlu0 %3713, %v1409_v10   ;;  %1829 = vperm.xlu1 %3714, %v2989_v20  }
 0x4b1   :  { %v1304_v6 = vpop.permute.xlu0 %1303 }
 0x4b2   :  { %v1479_v3 = vpop.permute.xlu1 %1478 }
 0x4b3   :  { %3715 = vset.pattern.permute.xlu0 %v3765_v1  ;;  %1839 = vperm.xlu1 %3714, %v2991_v22  }
 0x4b5   :  { %v1483_v8 = vpop.permute.xlu0 %1482 }
 0x4b6   :  { %v4351_v4 = vpop.permute.xlu1 %1437 }
 0x4b7   :  { %1990 = vperm.xlu1 %3714, %v3002_v23  }
 0x4b9   :  { %v4359_v10 = vpop.permute.xlu0 %1486 }
 0x4ba   :  { %v4353_v5 = vpop.permute.xlu1 %1442 }
 0x4bb   :  { %2098 = vperm.xlu1 %3714, %v4332_v12  }
 0x4bd   :  { %v4363_v23 = vpop.permute.xlu0 %1498 }
 0x4be   :  { %v4355_v7 = vpop.permute.xlu1 %1490 }
 0x4bf   :  { %2117 = vperm.xlu1 %3714, %v2103_v19  }
 0x4c2   :  { %v4357_v9 = vpop.permute.xlu1 %1545 }
 0x4c3   :  { %3716 = vset.pattern.permute.xlu1 %v3765_v1 }
 0x4c4   :  { %2167 = vperm.xlu1 %3716, %v2103_v19   ;;  %v712_v19 = vsel %vm711_vm2, %v4145_v29, 0.0 }
 0x4c6   :  { %v4361_v18 = vpop.permute.xlu1 %1447 }
 0x4c8   :  { %3717 = vset.pattern.permute.xlu1 %v3766_v2 }
 0x574   :  { %v3323_v14 = vpop.f32.mrb[10].mxu0 }
 0x575   :  { %v1256_v31 = vadd.f32 %v3323_v14, %v1128_v13  ;;  %v1250_v32 = vpop.f32.mrb[11].mxu0  ;;  %v4367_v13 = vpop.permute.xlu1 %1494 }
 0x576   :  { %v1251_v33 = vadd.f32 %v1250_v32, %v1123_v26  ;;  %v713_v26 = vrot.slane %v712_v19, 4 }
 0x577   :  { %v1290_v15 = vmax.f32 %v1256_v31, 0.0 }
 0x578   :  { %v1289_v16 = vmax.f32 %v1251_v33, 0.0  ;;  %v3326_v34 = vpop.f32.mrb[12].mxu0  ;;  %v714_v14 = vadd.f32 %v713_v26, %v712_v19 }
 0x579   :  { %v1266_v38 = vadd.f32 %v3326_v34, %v1138_v27  ;;  %v1260_v21 = vpop.f32.mrb[13].mxu0  ;;  %v1507_v27 = vpop.permute.xlu0 %1506 }
 0x57a   :  { %v3579_v17 = vpack.c.bf16 %v1290_v15, %v1289_v16  ;;  %v1261_v36 = vadd.f32 %v1260_v21, %v1133_v30  ;;  %v4369_v31 = vpop.permute.xlu1 %1550  ;;  %v1386_v15 = vrot.slane %v1383_v63, 6  ;;  %v715_v16 = vrot.slane %v714_v14, 2 }
 0x57b   :  { %v1292_v24 = vmax.f32 %v1266_v38, 0.0 }
 0x57c   :  { %v1291_v25 = vmax.f32 %v1261_v36, 0.0  ;;  %v3329_v39 = vpop.f32.mrb[14].mxu0  ;;  %3580 = vmatpush3.bf16.msra.mxu1 %v3579_v17  ;;  %v716_v29 = vadd.f32 %v715_v16, %v714_v14 }
 0x57d   :  { %v1276_v28 = vadd.f32 %v3329_v39, %v1148_v35  ;;  %v1270_v40 = vpop.f32.mrb[15].mxu0  ;;  %3581 = vmatprep.subr.bf16.mxu1 %v3767_v58  ;;  %v1413_v32 = vpop.permute.xlu0 %1412 }
 0x57e   :  { %v3582_v41 = vpack.c.bf16 %v1292_v24, %v1291_v25  ;;  %v1271_v42 = vadd.f32 %v1270_v40, %v1143_v37  ;;  %v1556_v36 = vpop.permute.xlu1 %1555 }
 0x57f   :  { %v1294_v43 = vmax.f32 %v1276_v28, 0.0  ;;  %v717_v28 = vrot.slane %v716_v29, 1 }
 0x580   :  { %v1293_v49 = vmax.f32 %v1271_v42, 0.0  ;;  %v3332_v53 = vpop.f32.mrb[16].mxu0  ;;  %3583 = vmatpush3.bf16.msra.mxu1 %v3582_v41 }
 0x581   :  { %v1286_v60 = vadd.f32 %v3332_v53, %v1158_v45  ;;  %v1280_v50 = vpop.f32.mrb[17].mxu0  ;;  %3584 = vmatprep.subr.bf16.mxu1 %v3767_v58  ;;  %v1433_v24 = vpop.permute.xlu0 %1432 }
 0x582   :  { %v3585_v61 = vpack.c.bf16 %v1294_v43, %v1293_v49  ;;  %v1281_v62 = vadd.f32 %v1280_v50, %v1153_v55  ;;  %v1463_v41 = vpop.permute.xlu1 %1462  ;;  %v718_v49 = vadd.f32 %v717_v28, %v716_v29 }
 0x583   :  { %v1296_v44 = vmax.f32 %v1286_v60, 0.0 }
 0x584   :  { %v1295_v56 = vmax.f32 %v1281_v62, 0.0  ;;  %3586 = vmatpush3.bf16.msra.mxu1 %v3585_v61 }
 0x585   :  { %3587 = vmatprep.subr.bf16.mxu1 %v3767_v58  ;;  %v1541_v45 = vpop.permute.xlu0 %1540 }
 0x586   :  { %v3588_v47 = vpack.c.bf16 %v1296_v44, %v1295_v56  ;;  %v1503_v61 = vpop.permute.xlu1 %1502 }
 0x588   :  { %3589 = vmatpush3.bf16.msra.mxu1 %v3588_v47 }
 0x589   :  { %v1453_v44 = vpop.permute.xlu0 %1452 }
 0x58b   :  { %3350 = vmatmul.mubr.msk.f32.vlgmr.msra.gmra.mrb[16].mxu1 %vm276_vm0, %v2933_v57  ;;  %v1561_v57 = vpop.permute.xlu1 %1560 }
 0x65e   :  { %v1375_v11 = vpop.f32.mrb[16].mxu1 }
 0x65f   :  { %v1376_v20 = vadd.f32 %v1375_v11, %v1304_v6  ;;  %v3351_v22 = vpop.f32.mrb[17].mxu1 }
 0x661   :  { %3729 = vtanh.f32 %v1376_v20  ;;  %v1388_v21 = vmul.f32 %v1386_v15, %v1376_v20 }
 0x663   :  { %v1390_v25 = vrot.slane %v1388_v21, 2 }
 0x665   :  { %v1392_v42 = vsub.f32 %v4150_v46, %v1390_v25 }
 0x667   :  { %v1393_v55 = vmul.f32 %v1392_v42, %v1383_v63 }
 0x66b   :  { %v3730_v30 = vpop.eup %3729 }
 0x66c   :  { %v1385_v33 = vmul.f32 %v3730_v30, %v1383_v63  ;;  %v1458_v63 = vpop.permute.xlu0 %1457 }
 0x66e   :  { %v1394_v34 = vsub.f32 0.0, %v1385_v33  ;;  %v1399_v38 = vsel %vm711_vm2, %v1385_v33, 0.0 }
 0x66f   :  { %v1400_v35 = vrot.slane %v1399_v38, 4 }
 0x670   :  { %v1395_v17 = vmul.f32 1.442695, %v1394_v34 }
 0x671   :  { %v1401_v37 = vadd.f32 %v1400_v35, %v1399_v38  ;;  %v1566_v38 = vpop.permute.xlu1 %1565 }
 0x672   :  { %3731 = vpow2.f32 %v1395_v17 }
 0x673   :  { %v1402_v39 = vrot.slane %v1401_v37, 2 }
 0x675   :  { %v1403_v40 = vadd.f32 %v1402_v39, %v1401_v37 }
 0x677   :  { %v1404_v43 = vrot.slane %v1403_v40, 1 }
 0x679   :  { %v1405_v53 = vadd.f32 %v1404_v43, %v1403_v40 }
 0x67b   :  { %v4373_v60 = vadd.f32 %v1405_v53, %v718_v49 }
 0x67c   :  { %v3732_v50 = vpop.eup %3731 }
 0x67d   :  { %v1397_v62 = vmul.f32 %v3732_v50, %v1393_v55 }
 0x67f   :  { %v4376_v56 = vadd.f32 %v1397_v62, %v4153_v48  ;;  %v2955_v62 = vld [vmem:[%s4690_s4 + $0x90] sm:$0xff] }
 0x681   :  { %v4379_v47 = vmul.f32 %v1413_v32, %v4376_v56 }
 0x683   :  { %v1468_v46 = vrot.slane %v4379_v47, %v3950_v51  ;;  %v1512_v54 = vrot.slane %v4379_v47, %v3952_v52 }
 0x685   :  { %v1475_v6 = vmul.f32 %v1468_v46, %v1458_v63  ;;  %v1476_v11 = vmul.f32 %v1468_v46, %v1463_v41  ;;  %v1469_v20 = vmul.f32 %v1468_v46, %v1428_v0  ;;  %v1470_v22 = vmul.f32 %v1468_v46, %v1433_v24  ;;  %v1571_v41 = vpop.permute.xlu0 %1570  ;;  %v2960_v63 = vld [vmem:[%s4690_s4 + $0xb8] sm:$0xff] }
 0x686   :  { %v1513_v19 = vmul.f32 %v1512_v54, %v1479_v3  ;;  %v1514_v26 = vmul.f32 %v1512_v54, %v1483_v8  ;;  %v1519_v14 = vmul.f32 %v1512_v54, %v1503_v61  ;;  %v1520_v48 = vmul.f32 %v1512_v54, %v1507_v27  ;;  %v2954_v61 = vld [vmem:[%s4690_s4 + $0x88] sm:$0xff] }
 0x687   :  { %v1471_v30 = vmul.f32 %v1468_v46, %v4351_v4  ;;  %v1472_v32 = vmul.f32 %v1468_v46, %v4353_v5  ;;  %v1515_v16 = vmul.f32 %v1512_v54, %v4359_v10  ;;  %v1516_v34 = vmul.f32 %v1512_v54, %v4355_v7 }
 0x688   :  { %v1521_v33 = vadd.f32 %v1513_v19, %v1469_v20  ;;  %v1522_v15 = vadd.f32 %v1514_v26, %v1470_v22  ;;  %v1473_v21 = vmul.f32 %v1468_v46, %v4361_v18  ;;  %v1474_v35 = vmul.f32 %v1468_v46, %v1453_v44  ;;  %v2956_v44 = vld [vmem:[%s4690_s4 + $0x98] sm:$0xff]  ;;  %v2958_v46 = vld [vmem:[%s4690_s4 + $0xa8] sm:$0xff] }
 0x689   :  { %v1523_v8 = vadd.f32 %v1515_v16, %v1471_v30  ;;  %v1524_v17 = vadd.f32 %v1516_v34, %v1472_v32  ;;  %v1527_v27 = vadd.f32 %v1519_v14, %v1475_v6  ;;  %v1528_v29 = vadd.f32 %v1520_v48, %v1476_v11  ;;  %v2977_v6 = vld [vmem:[%s4690_s4 + $0xc0] sm:$0xff]  ;;  %v1620_v11 = vpop.permute.xlu0 %1619 }
 0x68a   :  { %v1578_v0 = vadd.f32 %v1541_v45, %v1521_v33  ;;  %v1579_v3 = vadd.f32 %v4357_v9, %v1522_v15  ;;  %v1517_v4 = vmul.f32 %v1512_v54, %v4367_v13  ;;  %v1518_v5 = vmul.f32 %v1512_v54, %v4363_v23  ;;  %v1576_v9 = vpop.permute.xlu1 %1575  ;;  %v2959_v54 = vld [vmem:[%s4690_s4 + $0xb0] sm:$0xff]  ;;  %3396 = vmatprep.mubr.msk.f32.mxu1 %vm276_vm0, %v2977_v6  ;;  %v2219_v6 = vld [vmem:[%s4689_s3 + $0x28] sm:$0xff] }
 0x68b   :  { %v1580_v10 = vadd.f32 %v4369_v31, %v1523_v8  ;;  %v1581_v7 = vadd.f32 %v1556_v36, %v1524_v17  ;;  %v1584_v45 = vadd.f32 %v1571_v41, %v1527_v27  ;;  %v1585_v49 = vadd.f32 %v1576_v9, %v1528_v29 }
 0x68c   :  { %v1586_v37 = vmax.f32 %v1578_v0, 0.0  ;;  %v1587_v24 = vmax.f32 %v1579_v3, 0.0  ;;  %v1525_v25 = vadd.f32 %v1517_v4, %v1473_v21  ;;  %v1526_v39 = vadd.f32 %v1518_v5, %v1474_v35 }
 0x68d   :  { %v1588_v28 = vmax.f32 %v1580_v10, 0.0  ;;  %v1589_v40 = vmax.f32 %v1581_v7, 0.0  ;;  %v1592_v55 = vmax.f32 %v1584_v45, 0.0  ;;  %v1593_v31 = vmax.f32 %v1585_v49, 0.0  ;;  %v1630_v22 = vpop.permute.xlu0 %1629  ;;  %v2979_v45 = vld [vmem:[%s4690_s4 + $0xd0] sm:$0xff]  ;;  %v2980_v49 = vld [vmem:[%s4690_s4 + $0xd8] sm:$0xff] }
 0x68e   :  { %v3590_v18 = vpack.c.bf16 %v1587_v24, %v1586_v37  ;;  %v1582_v42 = vadd.f32 %v1561_v57, %v1525_v25  ;;  %v1583_v43 = vadd.f32 %v1566_v38, %v1526_v39  ;;  %v2957_v57 = vld [vmem:[%s4690_s4 + $0xa0] sm:$0xff]  ;;  %v1615_v20 = vpop.permute.xlu1 %1614 }
 0x68f   :  { %v3594_v13 = vpack.c.bf16 %v1589_v40, %v1588_v28  ;;  %v3602_v50 = vpack.c.bf16 %v1593_v31, %v1592_v55  ;;  %v2984_v55 = vld [vmem:[%s4690_s4 + $0xf8] sm:$0xff]  ;;  %v2104_v31 = vld [vmem:[%s4688_s2 + $0x10] sm:$0xff] }
 0x690   :  { %3591 = vmatprep.subr.bf16.mxu0 %v3590_v18  ;;  %v1590_v23 = vmax.f32 %v1582_v42, 0.0  ;;  %v1591_v53 = vmax.f32 %v1583_v43, 0.0  ;;  %v2978_v43 = vld [vmem:[%s4690_s4 + $0xc8] sm:$0xff]  ;;  %2122 = vperm.xlu1 %3717, %v2104_v31  }
 0x691   :  { %3593 = vmatpush3.bf16.msra.mxu0 %v3590_v18  ;;  %v1640_v38 = vpop.permute.xlu0 %1639 }
 0x692   :  { %3595 = vmatprep.subr.bf16.mxu0 %v3594_v13  ;;  %v3598_v36 = vpack.c.bf16 %v1591_v53, %v1590_v23  ;;  %v1625_v26 = vpop.permute.xlu1 %1624  ;;  %v2982_v23 = vld [vmem:[%s4690_s4 + $0xe8] sm:$0xff]  ;;  %v2983_v53 = vld [vmem:[%s4690_s4 + $0xf0] sm:$0xff] }
 0x694   :  { %3718 = vset.pattern.permute.xlu1 %v3765_v1 }
 0x695   :  { %3597 = vmatpush3.bf16.msra.mxu0 %v3594_v13  ;;  %v1650_v24 = vpop.permute.xlu0 %1649  ;;  %v2981_v13 = vld [vmem:[%s4690_s4 + $0xe0] sm:$0xff]  ;;  %2171 = vperm.xlu1 %3718, %v2104_v31  }
 0x696   :  { %3599 = vmatprep.subr.bf16.mxu0 %v3598_v36  ;;  %v1635_v0 = vpop.permute.xlu1 %1634 }
 0x699   :  { %3601 = vmatpush3.bf16.msra.mxu0 %v3598_v36  ;;  %v2102_v36 = vld [vmem:[%s4688_s2] sm:$0xff] }
 0x69a   :  { %3603 = vmatprep.subr.bf16.mxu0 %v3602_v50  ;;  %v1645_v25 = vpop.permute.xlu1 %1644  ;;  %2163 = vperm.xlu0 %3715, %v2102_v36  }
 0x69d   :  { %3605 = vmatpush3.bf16.msra.mxu0 %v3602_v50  ;;  %v2106_v50 = vld [vmem:[%s4688_s2 + $0x20] sm:$0xff] }
 0x69e   :  { %3622 = vmatprep.subr.bf16.mxu0 %v3767_v58  ;;  %2179 = vperm.xlu0 %3715, %v2106_v50  }
 0x6a0   :  { %3369 = vmatmul.mubr.msk.f32.vlgmr.msra.gmra.mrb[18].mxu0 %vm276_vm0, %v2954_v61  ;;  %v2108_v61 = vld [vmem:[%s4688_s2 + $0x30] sm:$0xff] }
 0x6a1   :  { %3371 = vmatprep.mubr.msk.f32.mxu0 %vm276_vm0, %v2955_v62  ;;  %v2105_v62 = vld [vmem:[%s4688_s2 + $0x18] sm:$0xff] }
 0x6a2   :  { %2187 = vperm.xlu0 %3715, %v2108_v61   ;;  %2175 = vperm.xlu1 %3718, %v2105_v62  }
 0x6a4   :  { %3372 = vmatmul.mubr.msk.f32.gmra.mrb[20].mxu0 %vm276_vm0, %v2956_v44  ;;  %v2215_v44 = vld [vmem:[%s4689_s3 + $0x8] sm:$0xff] }
 0x6a5   :  { %3374 = vmatprep.mubr.msk.f32.mxu0 %vm276_vm0, %v2957_v57  ;;  %v2107_v57 = vld [vmem:[%s4688_s2 + $0x28] sm:$0xff] }
 0x6a6   :  { %3722 = vset.pattern.permute.xlu0 %v3766_v2  ;;  %3719 = vset.pattern.permute.xlu1 %v3766_v2 }
 0x6a7   :  { %2112 = vperm.xlu0 %3722, %v2102_v36   ;;  %2229 = vperm.xlu1 %3719, %v2215_v44  }
 0x6a8   :  { %3375 = vmatmul.mubr.msk.f32.gmra.mrb[22].mxu0 %vm276_vm0, %v2958_v46  ;;  %v2214_v46 = vld [vmem:[%s4689_s3] sm:$0xff] }
 0x6a9   :  { %3377 = vmatprep.mubr.msk.f32.mxu0 %vm276_vm0, %v2959_v54  ;;  %v2216_v54 = vld [vmem:[%s4689_s3 + $0x10] sm:$0xff] }
 0x6ab   :  { %2127 = vperm.xlu0 %3722, %v2105_v62   ;;  %2137 = vperm.xlu1 %3719, %v2107_v57  }
 0x6ac   :  { %3378 = vmatmul.mubr.msk.f32.gmra.mrb[24].mxu0 %vm276_vm0, %v2960_v63  ;;  %v2217_v63 = vld [vmem:[%s4689_s3 + $0x18] sm:$0xff] }
 0x6ad   :  { %3424 = vmatprep.mubr.msk.f32.mxu0 %vm3768_vm1, %v3769_v59 }
 0x6af   :  { %2224 = vperm.xlu0 %3722, %v2214_v46   ;;  %3720 = vset.pattern.permute.xlu1 %v3765_v1 }
 0x6b0   :  { %2183 = vperm.xlu1 %3720, %v2107_v57  }
 0x6b3   :  { %2132 = vperm.xlu0 %3722, %v2106_v50  }
 0x6b4   :  { %3721 = vset.pattern.permute.xlu1 %v3766_v2 }
 0x6b5   :  { %2234 = vperm.xlu1 %3721, %v2216_v54  }
 0x6b7   :  { %2239 = vperm.xlu0 %3722, %v2217_v63  }
 0x6b9   :  { %2142 = vperm.xlu1 %3721, %v2108_v61  }
 0x6bb   :  { %2249 = vperm.xlu0 %3722, %v2219_v6  }
 0x773   :  { %v3370_v19 = vpop.f32.mrb[18].mxu0 }
 0x774   :  { %v1748_v14 = vadd.f32 %v3370_v19, %v1620_v11  ;;  %v1742_v48 = vpop.f32.mrb[19].mxu0  ;;  %v2109_v11 = vld [vmem:[%s4688_s2 + $0x38] sm:$0xff]  ;;  %v2290_v19 = vld [vmem:[%s4691_s5 + $0x20] sm:$0xff] }
 0x775   :  { %v1743_v30 = vadd.f32 %v1742_v48, %v1615_v20  ;;  %v2286_v20 = vld [vmem:[%s4691_s5] sm:$0xff]  ;;  %2147 = vperm.xlu1 %3721, %v2109_v11  }
 0x776   :  { %v1782_v32 = vmax.f32 %v1748_v14, 0.0  ;;  %2296 = vperm.xlu0 %3722, %v2286_v20   ;;  %v2292_v14 = vld [vmem:[%s4691_s5 + $0x30] sm:$0xff]  ;;  %v3020_v48 = vld [vmem:[%s4691_s5 + $0x40] sm:$0xff] }
 0x777   :  { %v1781_v33 = vmax.f32 %v1743_v30, 0.0  ;;  %v3373_v15 = vpop.f32.mrb[20].mxu0  ;;  %v3022_v30 = vld [vmem:[%s4691_s5 + $0x50] sm:$0xff]  ;;  %v3001_v20 = vld [vmem:[%s4692_s6 + $0x4] sm:$0xf] }
 0x778   :  { %v1758_v16 = vadd.f32 %v3373_v15, %v1630_v22  ;;  %v1752_v34 = vpop.f32.mrb[21].mxu0  ;;  %v2288_v22 = vld [vmem:[%s4691_s5 + $0x10] sm:$0xff]  ;;  %v2289_v15 = vld [vmem:[%s4691_s5 + $0x18] sm:$0xff] }
 0x779   :  { %v3606_v21 = vpack.c.bf16 %v1782_v32, %v1781_v33  ;;  %v1753_v35 = vadd.f32 %v1752_v34, %v1625_v26  ;;  %3723 = vset.pattern.permute.xlu1 %v3765_v1  ;;  %v2218_v26 = vld [vmem:[%s4689_s3 + $0x20] sm:$0xff]  ;;  %v2220_v1 = vld [vmem:[%s4689_s3 + $0x30] sm:$0xff]  ;;  %v2287_v32 = vld [vmem:[%s4691_s5 + $0x8] sm:$0xff] }
 0x77a   :  { %v1784_v3 = vmax.f32 %v1758_v16, 0.0  ;;  %2191 = vperm.xlu1 %3723, %v2109_v11   ;;  %2306 = vperm.xlu0 %3722, %v2288_v22   ;;  %v3024_v33 = vld [vmem:[%s4691_s5 + $0x60] sm:$0xff]  ;;  %v3026_v16 = vld [vmem:[%s4691_s5 + $0x70] sm:$0xff]  ;;  %v2291_v34 = vld [vmem:[%s4691_s5 + $0x28] sm:$0xff] }
 0x77b   :  { %v1783_v8 = vmax.f32 %v1753_v35, 0.0  ;;  %v3376_v17 = vpop.f32.mrb[22].mxu0  ;;  %3607 = vmatprep.subr.bf16.mxu1 %v3606_v21  ;;  %v3021_v35 = vld [vmem:[%s4691_s5 + $0x48] sm:$0xff]  ;;  %v2278_v22 = vld [vmem:[%s4690_s4] sm:$0xff] }
 0x77c   :  { %v1768_v27 = vadd.f32 %v3376_v17, %v1640_v38  ;;  %v1762_v29 = vpop.f32.mrb[23].mxu0  ;;  %3609 = vmatpush3.bf16.msra.mxu1 %v3606_v21  ;;  %v2667_v38 = vld [vmem:[%s4693_s7] sm:$0xf]  ;;  %v2293_v21 = vld [vmem:[%s4691_s5 + $0x38] sm:$0xff]  ;;  %v2095_v17 = vsub.f32 1.0, %v4332_v12 }
 0x77d   :  { %v3610_v4 = vpack.c.bf16 %v1784_v3, %v1783_v8  ;;  %v1763_v5 = vadd.f32 %v1762_v29, %v1635_v0  ;;  %v3023_v0 = vld [vmem:[%s4691_s5 + $0x58] sm:$0xff]  ;;  %v3025_v3 = vld [vmem:[%s4691_s5 + $0x68] sm:$0xff]  ;;  %v1810_v29 = vpop.permute.xlu1 %1809 }
 0x77e   :  { %v1786_v37 = vmax.f32 %v1768_v27, 0.0  ;;  %3724 = vset.pattern.permute.xlu1 %v3766_v2  ;;  %2316 = vperm.xlu0 %3722, %v2290_v19   ;;  %v2221_v2 = vld [vmem:[%s4689_s3 + $0x38] sm:$0xff]  ;;  %v1815_v27 = vpop.permute.xlu0 %1814 }
 0x77f   :  { %v1785_v10 = vmax.f32 %v1763_v5, 0.0  ;;  %v3379_v7 = vpop.f32.mrb[24].mxu0  ;;  %3611 = vmatprep.subr.bf16.mxu1 %v3610_v4  ;;  %2244 = vperm.xlu1 %3724, %v2218_v26   ;;  %v3027_v8 = vld [vmem:[%s4691_s5 + $0x78] sm:$0xff] }
 0x780   :  { %v1778_v39 = vadd.f32 %v3379_v7, %v1650_v24  ;;  %v1772_v18 = vpop.f32.mrb[25].mxu0  ;;  %3613 = vmatpush3.bf16.msra.mxu1 %v3610_v4 }
 0x781   :  { %v3614_v28 = vpack.c.bf16 %v1786_v37, %v1785_v10  ;;  %v1773_v40 = vadd.f32 %v1772_v18, %v1645_v25  ;;  %v1820_v37 = vpop.permute.xlu1 %1819 }
 0x782   :  { %v1788_v41 = vmax.f32 %v1778_v39, 0.0  ;;  %2326 = vperm.xlu0 %3722, %v2292_v14   ;;  %v1825_v4 = vpop.permute.xlu0 %1824 }
 0x783   :  { %v1787_v9 = vmax.f32 %v1773_v40, 0.0  ;;  %3615 = vmatprep.subr.bf16.mxu1 %v3614_v28  ;;  %2254 = vperm.xlu1 %3724, %v2220_v1  }
 0x784   :  { %3617 = vmatpush3.bf16.msra.mxu1 %v3614_v28 }
 0x785   :  { %v3618_v42 = vpack.c.bf16 %v1788_v41, %v1787_v9 }
 0x786   :  { %2491 = vperm.xlu0 %3722, %v3020_v48   ;;  %v1835_v41 = vpop.permute.xlu0 %1834 }
 0x787   :  { %3619 = vmatprep.subr.bf16.mxu1 %v3618_v42  ;;  %2259 = vperm.xlu1 %3724, %v2221_v2  }
 0x788   :  { %3621 = vmatpush3.bf16.msra.mxu1 %v3618_v42 }
 0x78a   :  { %2501 = vperm.xlu0 %3722, %v3022_v30   ;;  %v1845_v36 = vpop.permute.xlu0 %1844 }
 0x78b   :  { %3397 = vmatmul.mubr.msk.f32.vlgmr.msra.gmra.mrb[18].mxu1 %vm276_vm0, %v2978_v43  ;;  %2301 = vperm.xlu1 %3724, %v2287_v32   ;;  %v1830_v43 = vpop.permute.xlu1 %1829 }
 0x78c   :  { %3399 = vmatprep.mubr.msk.f32.mxu1 %vm276_vm0, %v2979_v45 }
 0x78e   :  { %2511 = vperm.xlu0 %3722, %v3024_v33   ;;  %v2070_v32 = vpop.permute.xlu0 %2069 }
 0x78f   :  { %3400 = vmatmul.mubr.msk.f32.gmra.mrb[20].mxu1 %vm276_vm0, %v2980_v49  ;;  %2311 = vperm.xlu1 %3724, %v2289_v15   ;;  %v1840_v62 = vpop.permute.xlu1 %1839 }
 0x790   :  { %3402 = vmatprep.mubr.msk.f32.mxu1 %vm276_vm0, %v2981_v13 }
 0x792   :  { %2521 = vperm.xlu0 %3722, %v3026_v16   ;;  %v2164_v15 = vpop.permute.xlu0 %2163 }
 0x793   :  { %3403 = vmatmul.mubr.msk.f32.gmra.mrb[22].mxu1 %vm276_vm0, %v2982_v23  ;;  %2321 = vperm.xlu1 %3724, %v2291_v34   ;;  %v1991_v19 = vpop.permute.xlu1 %1990 }
 0x794   :  { %3405 = vmatprep.mubr.msk.f32.mxu1 %vm276_vm0, %v2983_v53 }
 0x796   :  { %2670 = vperm.xlu0 %3722, %v2667_v38  }
 0x797   :  { %3406 = vmatmul.mubr.msk.f32.gmra.mrb[24].mxu1 %vm276_vm0, %v2984_v55  ;;  %2331 = vperm.xlu1 %3724, %v2293_v21   ;;  %v2099_v26 = vpop.permute.xlu1 %2098 }
 0x798   :  { %3443 = vmatprep.mubr.msk.f32.mxu1 %vm276_vm0, %v2278_v22 }
 0x79b   :  { %2496 = vperm.xlu1 %3724, %v3021_v35   ;;  %v2118_v14 = vpop.permute.xlu1 %2117  ;;  %v2180_v35 = vpop.permute.xlu0 %2179 }
 0x79f   :  { %2506 = vperm.xlu1 %3724, %v3023_v0   ;;  %v2168_v1 = vpop.permute.xlu1 %2167 }
 0x7a3   :  { %2516 = vperm.xlu1 %3724, %v3025_v3   ;;  %v2123_v48 = vpop.permute.xlu1 %2122  ;;  %v2188_v3 = vpop.permute.xlu0 %2187 }
 0x7a7   :  { %2526 = vperm.xlu1 %3724, %v3027_v8   ;;  %v4572_v2 = vpop.permute.xlu1 %2171 }
 0x7ab   :  { %2749 = vperm.xlu1 %3724, %v2095_v17   ;;  %v4574_v30 = vpop.permute.xlu1 %2175 }
 0x7af   :  { %v4576_v33 = vpop.permute.xlu1 %2229 }
 0x7b3   :  { %v2138_v21 = vpop.permute.xlu1 %2137 }
 0x7b7   :  { %v2184_v0 = vpop.permute.xlu1 %2183 }
 0x85e   :  { %v3398_v5 = vpop.f32.mrb[18].mxu1 }
 0x85f   :  { %v1943_v24 = vadd.f32 %v3398_v5, %v1815_v27  ;;  %v1937_v10 = vpop.f32.mrb[19].mxu1  ;;  %v2073_v27 = vrot.slane %v2070_v32, 6 }
 0x860   :  { %v1938_v7 = vadd.f32 %v1937_v10, %v1810_v29  ;;  %v4578_v29 = vpop.permute.xlu1 %2234 }
 0x861   :  { %v1977_v25 = vmax.f32 %v1943_v24, 0.0 }
 0x862   :  { %v1976_v39 = vmax.f32 %v1938_v7, 0.0  ;;  %v3401_v18 = vpop.f32.mrb[20].mxu1 }
 0x863   :  { %v1953_v28 = vadd.f32 %v3401_v18, %v1825_v4  ;;  %v1947_v40 = vpop.f32.mrb[21].mxu1 }
 0x864   :  { %v3623_v9 = vpack.c.bf16 %v1977_v25, %v1976_v39  ;;  %v1948_v42 = vadd.f32 %v1947_v40, %v1820_v37  ;;  %v2113_v37 = vpop.permute.xlu0 %2112  ;;  %v2143_v39 = vpop.permute.xlu1 %2142 }
 0x865   :  { %v1979_v12 = vmax.f32 %v1953_v28, 0.0 }
 0x866   :  { %v1978_v45 = vmax.f32 %v1948_v42, 0.0  ;;  %v3404_v49 = vpop.f32.mrb[22].mxu1  ;;  %3624 = vmatpush3.bf16.msra.mxu0 %v3623_v9 }
 0x867   :  { %v1963_v13 = vadd.f32 %v3404_v49, %v1835_v41  ;;  %v1957_v23 = vpop.f32.mrb[23].mxu1  ;;  %3625 = vmatprep.subr.bf16.mxu0 %v3767_v58 }
 0x868   :  { %v3626_v53 = vpack.c.bf16 %v1979_v12, %v1978_v45  ;;  %v1958_v55 = vadd.f32 %v1957_v23, %v1830_v43  ;;  %v2128_v40 = vpop.permute.xlu0 %2127  ;;  %v2148_v43 = vpop.permute.xlu1 %2147 }
 0x869   :  { %v1981_v31 = vmax.f32 %v1963_v13, 0.0 }
 0x86a   :  { %v1980_v50 = vmax.f32 %v1958_v55, 0.0  ;;  %v3407_v61 = vpop.f32.mrb[24].mxu1  ;;  %3627 = vmatpush3.bf16.msra.mxu0 %v3626_v53 }
 0x86b   :  { %v1973_v44 = vadd.f32 %v3407_v61, %v1845_v36  ;;  %v1967_v57 = vpop.f32.mrb[25].mxu1  ;;  %3628 = vmatprep.subr.bf16.mxu0 %v3767_v58 }
 0x86c   :  { %v3629_v46 = vpack.c.bf16 %v1981_v31, %v1980_v50  ;;  %v1968_v54 = vadd.f32 %v1967_v57, %v1840_v62  ;;  %v2225_v45 = vpop.permute.xlu0 %2224  ;;  %v2192_v55 = vpop.permute.xlu1 %2191 }
 0x86d   :  { %v1983_v63 = vmax.f32 %v1973_v44, 0.0 }
 0x86e   :  { %v1982_v6 = vmax.f32 %v1968_v54, 0.0  ;;  %3630 = vmatpush3.bf16.msra.mxu0 %v3629_v46 }
 0x86f   :  { %3631 = vmatprep.subr.bf16.mxu0 %v3767_v58 }
 0x870   :  { %v3632_v11 = vpack.c.bf16 %v1983_v63, %v1982_v6  ;;  %v2133_v36 = vpop.permute.xlu0 %2132  ;;  %v2245_v62 = vpop.permute.xlu1 %2244 }
 0x872   :  { %3633 = vmatpush3.bf16.msra.mxu0 %v3632_v11 }
 0x874   :  { %v2240_v54 = vpop.permute.xlu0 %2239 }
 0x875   :  { %3425 = vmatmul.mubr.msk.f32.vlgmr.msra.gmra.mrb[26].mxu0 %vm276_vm0, %v3001_v20 }
 0x948   :  { %v2062_v16 = vpop.f32.mrb[26].mxu0 }
 0x949   :  { %v2063_v34 = vadd.f32 %v2062_v16, %v1991_v19  ;;  %v3426_v38 = vpop.f32.mrb[27].mxu0 }
 0x94b   :  { %3733 = vtanh.f32 %v2063_v34  ;;  %v2075_v24 = vmul.f32 %v2073_v27, %v2063_v34 }
 0x94d   :  { %v2077_v18 = vrot.slane %v2075_v24, 2 }
 0x94f   :  { %v2079_v9 = vsub.f32 %v4376_v56, %v2077_v18 }
 0x951   :  { %v2080_v49 = vmul.f32 %v2079_v9, %v2070_v32 }
 0x955   :  { %v3734_v8 = vpop.eup %3733 }
 0x956   :  { %v2072_v17 = vmul.f32 %v3734_v8, %v2070_v32  ;;  %v2255_v8 = vpop.permute.xlu1 %2254 }
 0x958   :  { %v2081_v4 = vsub.f32 0.0, %v2072_v17  ;;  %v2086_v5 = vsel %vm711_vm2, %v2072_v17, 0.0  ;;  %v2250_v17 = vpop.permute.xlu0 %2249 }
 0x959   :  { %v2087_v10 = vrot.slane %v2086_v5, 4 }
 0x95a   :  { %v2082_v7 = vmul.f32 1.442695, %v2081_v4 }
 0x95b   :  { %v2088_v25 = vadd.f32 %v2087_v10, %v2086_v5 }
 0x95c   :  { %3735 = vpow2.f32 %v2082_v7 }
 0x95d   :  { %v2089_v28 = vrot.slane %v2088_v25, 2 }
 0x95f   :  { %v2090_v41 = vadd.f32 %v2089_v28, %v2088_v25  ;;  %v2260_v25 = vpop.permute.xlu1 %2259 }
 0x961   :  { %v2091_v42 = vrot.slane %v2090_v41, 1 }
 0x963   :  { %v2092_v12 = vadd.f32 %v2091_v42, %v2090_v41 }
 0x965   :  { %v4583_v13 = vadd.f32 %v2092_v12, %v4373_v60  ;;  %v2280_v12 = vld [vmem:[%s4690_s4 + $0x10] sm:$0xff] }
 0x966   :  { %v3736_v23 = vpop.eup %3735 }
 0x967   :  { %v2084_v53 = vmul.f32 %v3736_v23, %v2080_v49  ;;  %v2282_v49 = vld [vmem:[%s4690_s4 + $0x20] sm:$0xff]  ;;  %v2283_v23 = vld [vmem:[%s4690_s4 + $0x28] sm:$0xff] }
 0x969   :  { %v4586_v31 = vadd.f32 %v2084_v53, %v4379_v47  ;;  %v2284_v53 = vld [vmem:[%s4690_s4 + $0x30] sm:$0xff] }
 0x96b   :  { %v4589_v50 = vmul.f32 %v2099_v26, %v4586_v31 }
 0x96d   :  { %v2153_v56 = vrot.slane %v4589_v50, %v3950_v51  ;;  %v2197_v61 = vrot.slane %v4589_v50, %v3952_v52 }
 0x96f   :  { %v2158_v44 = vmul.f32 %v2153_v56, %v2133_v36  ;;  %v2159_v60 = vmul.f32 %v2153_v56, %v2138_v21  ;;  %v2202_v57 = vmul.f32 %v2197_v61, %v2180_v35  ;;  %v2203_v46 = vmul.f32 %v2197_v61, %v2184_v0  ;;  %v3012_v36 = vld [vmem:[%s4690_s4 + $0x40] sm:$0xff] }
 0x970   :  { %v2154_v63 = vmul.f32 %v2153_v56, %v2113_v37  ;;  %v2155_v6 = vmul.f32 %v2153_v56, %v2118_v14  ;;  %v2160_v47 = vmul.f32 %v2153_v56, %v2143_v39  ;;  %v2204_v11 = vmul.f32 %v2197_v61, %v2188_v3  ;;  %3471 = vmatprep.mubr.msk.f32.mxu0 %vm276_vm0, %v3012_v36 }
 0x971   :  { %v2198_v20 = vmul.f32 %v2197_v61, %v2164_v15  ;;  %v2199_v22 = vmul.f32 %v2197_v61, %v2168_v1  ;;  %v2161_v19 = vmul.f32 %v2153_v56, %v2148_v43  ;;  %v2205_v26 = vmul.f32 %v2197_v61, %v2192_v55  ;;  %v2285_v55 = vld [vmem:[%s4690_s4 + $0x38] sm:$0xff] }
 0x972   :  { %v2156_v32 = vmul.f32 %v2153_v56, %v2123_v48  ;;  %v2157_v16 = vmul.f32 %v2153_v56, %v2128_v40  ;;  %v2210_v51 = vadd.f32 %v2202_v57, %v2158_v44  ;;  %v2211_v34 = vadd.f32 %v2203_v46, %v2159_v60  ;;  %v2302_v56 = vpop.permute.xlu1 %2301 }
 0x973   :  { %v2206_v38 = vadd.f32 %v2198_v20, %v2154_v63  ;;  %v2207_v52 = vadd.f32 %v2199_v22, %v2155_v6  ;;  %v2200_v21 = vmul.f32 %v2197_v61, %v4572_v2  ;;  %v2201_v35 = vmul.f32 %v2197_v61, %v4574_v30  ;;  %v2297_v61 = vpop.permute.xlu0 %2296 }
 0x974   :  { %v2212_v3 = vadd.f32 %v2204_v11, %v2160_v47  ;;  %v2213_v15 = vadd.f32 %v2205_v26, %v2161_v19  ;;  %v2266_v4 = vadd.f32 %v2245_v62, %v2210_v51  ;;  %v2267_v48 = vadd.f32 %v2250_v17, %v2211_v34 }
 0x975   :  { %v2262_v0 = vadd.f32 %v2225_v45, %v2206_v38  ;;  %v2263_v14 = vadd.f32 %v4576_v33, %v2207_v52  ;;  %v2208_v1 = vadd.f32 %v2200_v21, %v2156_v32  ;;  %v2209_v27 = vadd.f32 %v2201_v35, %v2157_v16  ;;  %v2281_v45 = vld [vmem:[%s4690_s4 + $0x18] sm:$0xff] }
 0x976   :  { %v2274_v30 = vmax.f32 %v2266_v4, 0.0  ;;  %v2275_v18 = vmax.f32 %v2267_v48, 0.0  ;;  %v2268_v28 = vadd.f32 %v2255_v8, %v2212_v3  ;;  %v2269_v33 = vadd.f32 %v2260_v25, %v2213_v15  ;;  %v2312_v62 = vpop.permute.xlu1 %2311  ;;  %v3017_v25 = vld [vmem:[%s4690_s4 + $0x68] sm:$0xff] }
 0x977   :  { %v2270_v5 = vmax.f32 %v2262_v0, 0.0  ;;  %v2271_v37 = vmax.f32 %v2263_v14, 0.0  ;;  %v2264_v24 = vadd.f32 %v4578_v29, %v2208_v1  ;;  %v2265_v10 = vadd.f32 %v2240_v54, %v2209_v27  ;;  %v2279_v29 = vld [vmem:[%s4690_s4 + $0x8] sm:$0xff]  ;;  %v2307_v60 = vpop.permute.xlu0 %2306 }
 0x978   :  { %v3642_v41 = vpack.c.bf16 %v2275_v18, %v2274_v30  ;;  %v2276_v9 = vmax.f32 %v2268_v28, 0.0  ;;  %v2277_v42 = vmax.f32 %v2269_v33, 0.0 }
 0x979   :  { %v3634_v7 = vpack.c.bf16 %v2271_v37, %v2270_v5  ;;  %v2272_v2 = vmax.f32 %v2264_v24, 0.0  ;;  %v2273_v39 = vmax.f32 %v2265_v10, 0.0  ;;  %v3013_v37 = vld [vmem:[%s4690_s4 + $0x48] sm:$0xff]  ;;  %v3014_v24 = vld [vmem:[%s4690_s4 + $0x50] sm:$0xff]  ;;  %v3015_v10 = vld [vmem:[%s4690_s4 + $0x58] sm:$0xff] }
 0x97a   :  { %v3646_v43 = vpack.c.bf16 %v2277_v42, %v2276_v9 }
 0x97b   :  { %3635 = vmatprep.subr.bf16.mxu1 %v3634_v7  ;;  %v3638_v40 = vpack.c.bf16 %v2273_v39, %v2272_v2  ;;  %v2317_v26 = vpop.permute.xlu0 %2316  ;;  %v3018_v2 = vld [vmem:[%s4690_s4 + $0x70] sm:$0xff]  ;;  %v3019_v39 = vld [vmem:[%s4690_s4 + $0x78] sm:$0xff] }
 0x97c   :  { %3637 = vmatpush3.bf16.msra.mxu1 %v3634_v7  ;;  %v3016_v7 = vld [vmem:[%s4690_s4 + $0x60] sm:$0xff] }
 0x97d   :  { %3639 = vmatprep.subr.bf16.mxu1 %v3638_v40 }
 0x97f   :  { %v2327_v17 = vpop.permute.xlu0 %2326 }
 0x980   :  { %3641 = vmatpush3.bf16.msra.mxu1 %v3638_v40 }
 0x981   :  { %3643 = vmatprep.subr.bf16.mxu1 %v3642_v41 }
 0x983   :  { %v2492_v18 = vpop.permute.xlu0 %2491 }
 0x984   :  { %3645 = vmatpush3.bf16.msra.mxu1 %v3642_v41 }
 0x985   :  { %3647 = vmatprep.subr.bf16.mxu1 %v3646_v43 }
 0x987   :  { %v2502_v40 = vpop.permute.xlu0 %2501 }
 0x988   :  { %3649 = vmatpush3.bf16.msra.mxu1 %v3646_v43 }
 0x989   :  { %3666 = vmatprep.subr.bf16.mxu1 %v3767_v58 }
 0x98b   :  { %3444 = vmatmul.mubr.msk.f32.vlgmr.msra.gmra.mrb[26].mxu1 %vm276_vm0, %v2279_v29  ;;  %v2512_v36 = vpop.permute.xlu0 %2511 }
 0x98c   :  { %3446 = vmatprep.mubr.msk.f32.mxu1 %vm276_vm0, %v2280_v12 }
 0x98f   :  { %3447 = vmatmul.mubr.msk.f32.gmra.mrb[28].mxu1 %vm276_vm0, %v2281_v45 }
 0x990   :  { %3449 = vmatprep.mubr.msk.f32.mxu1 %vm276_vm0, %v2282_v49 }
 0x993   :  { %3450 = vmatmul.mubr.msk.f32.gmra.mrb[30].mxu1 %vm276_vm0, %v2283_v23 }
 0x994   :  { %3452 = vmatprep.mubr.msk.f32.mxu1 %vm276_vm0, %v2284_v53 }
 0x997   :  { %3453 = vmatmul.mubr.msk.f32.gmra.mrb[32].mxu1 %vm276_vm0, %v2285_v55 }
 0x998   :  { %3499 = vmatprep.mubr.msk.f32.mxu1 %vm3768_vm1, %v3769_v59  ;;  %v2322_v59 = vpop.permute.xlu1 %2321 }
 0x99c   :  { %v2332_v35 = vpop.permute.xlu1 %2331 }
 0x9a0   :  { %v2497_v30 = vpop.permute.xlu1 %2496 }
 0x9a4   :  { %v2507_v28 = vpop.permute.xlu1 %2506 }
 0x9a8   :  { %v2517_v23 = vpop.permute.xlu1 %2516 }
 0xa5e   :  { %v3445_v44 = vpop.f32.mrb[26].mxu1 }
 0xa5f   :  { %v2430_v57 = vadd.f32 %v3445_v44, %v2302_v56  ;;  %v2424_v46 = vpop.f32.mrb[27].mxu1 }
 0xa60   :  { %v2425_v54 = vadd.f32 %v2424_v46, %v2297_v61 }
 0xa61   :  { %v2464_v63 = vmax.f32 %v2430_v57, 0.0 }
 0xa62   :  { %v2463_v6 = vmax.f32 %v2425_v54, 0.0  ;;  %v3448_v47 = vpop.f32.mrb[28].mxu1 }
 0xa63   :  { %v2440_v11 = vadd.f32 %v3448_v47, %v2312_v62  ;;  %v2434_v20 = vpop.f32.mrb[29].mxu1 }
 0xa64   :  { %v3650_v22 = vpack.c.bf16 %v2464_v63, %v2463_v6  ;;  %v2435_v19 = vadd.f32 %v2434_v20, %v2307_v60  ;;  %v2527_v63 = vpop.permute.xlu1 %2526 }
 0xa65   :  { %v2466_v32 = vmax.f32 %v2440_v11, 0.0  ;;  %v2522_v11 = vpop.permute.xlu0 %2521 }
 0xa66   :  { %v2465_v16 = vmax.f32 %v2435_v19, 0.0  ;;  %v3451_v51 = vpop.f32.mrb[30].mxu1  ;;  %3651 = vmatprep.subr.bf16.mxu0 %v3650_v22 }
 0xa67   :  { %v2450_v34 = vadd.f32 %v3451_v51, %v2322_v59  ;;  %v2444_v38 = vpop.f32.mrb[31].mxu1  ;;  %3653 = vmatpush3.bf16.msra.mxu0 %v3650_v22  ;;  %v2666_v51 = vld [vmem:[%s4692_s6] sm:$0xf]  ;;  %s3770_s6 = smov [#allocation2]  }
 0xa68   :  { %v3654_v52 = vpack.c.bf16 %v2466_v32, %v2465_v16  ;;  %v2445_v8 = vadd.f32 %v2444_v38, %v2317_v26  ;;  %s2792_s11 = sshll.u32 %s3770_s6, 4  ;;  %s2793_s11 = int_to_ptr.vmem [resolvable:$true] %s2792_s11 }
 0xa69   :  { %v2468_v21 = vmax.f32 %v2450_v34, 0.0  ;;  %v2671_v34 = vpop.permute.xlu0 %2670  ;;  %s3741_s12 = scalar_lea.vmem %s2793_s11, 16  ;;  %s3745_s13 = scalar_lea.vmem %s2793_s11, 32 }
 0xa6a   :  { %v2467_v0 = vmax.f32 %v2445_v8, 0.0  ;;  %v3454_v14 = vpop.f32.mrb[32].mxu1  ;;  %3655 = vmatprep.subr.bf16.mxu0 %v3654_v52  ;;  %p3742_p0 = scmp.ne.s32.totalorder %s2793_s11, %s3741_s12  ;;  %p3746_p1 = scmp.lt.s32.totalorder %s2793_s11, %s2793_s11 }
 0xa6b   :  { %v2460_v3 = vadd.f32 %v3454_v14, %v2332_v35  ;;  %v2454_v15 = vpop.f32.mrb[33].mxu1  ;;  %3657 = vmatpush3.bf16.msra.mxu0 %v3654_v52  ;;  %p3747_p2 = scmp.lt.s32.totalorder %s3745_s13, %s3741_s12 }
 0xa6c   :  { %v3658_v1 = vpack.c.bf16 %v2468_v21, %v2467_v0  ;;  %v2455_v27 = vadd.f32 %v2454_v15, %v2327_v17  ;;  %v2750_v21 = vpop.permute.xlu1 %2749 }
 0xa6d   :  { %v2470_v4 = vmax.f32 %v2460_v3, 0.0  ;;  %v2753_v14 = vrot.slane %v2750_v21, 6  ;;  %p3748_p3 = por %p3747_p2, %p3746_p1 }
 0xa6e   :  { %v2469_v48 = vmax.f32 %v2455_v27, 0.0  ;;  %3659 = vmatprep.subr.bf16.mxu0 %v3658_v1 }
 0xa6f   :  { %3661 = vmatpush3.bf16.msra.mxu0 %v3658_v1  ;;  %p3749_p4 = pnand %p3748_p3, %p3742_p0 }
 0xa70   :  { %v3662_v5 = vpack.c.bf16 %v2470_v4, %v2469_v48 }
 0xa72   :  { %3663 = vmatprep.subr.bf16.mxu0 %v3662_v5 }
 0xa73   :  { %3665 = vmatpush3.bf16.msra.mxu0 %v3662_v5 }
 0xa76   :  { %3472 = vmatmul.mubr.msk.f32.vlgmr.msra.gmra.mrb[28].mxu0 %vm276_vm0, %v3013_v37 }
 0xa77   :  { %3474 = vmatprep.mubr.msk.f32.mxu0 %vm276_vm0, %v3014_v24 }
 0xa7a   :  { %3475 = vmatmul.mubr.msk.f32.gmra.mrb[30].mxu0 %vm276_vm0, %v3015_v10 }
 0xa7b   :  { %3477 = vmatprep.mubr.msk.f32.mxu0 %vm276_vm0, %v3016_v7 }
 0xa7e   :  { %3478 = vmatmul.mubr.msk.f32.gmra.mrb[32].mxu0 %vm276_vm0, %v3017_v25 }
 0xa7f   :  { %3480 = vmatprep.mubr.msk.f32.mxu0 %vm276_vm0, %v3018_v2 }
 0xa82   :  { %3481 = vmatmul.mubr.msk.f32.gmra.mrb[34].mxu0 %vm276_vm0, %v3019_v39 }
 0xb49   :  { %v3473_v33 = vpop.f32.mrb[28].mxu0 }
 0xb4a   :  { %v2625_v41 = vadd.f32 %v3473_v33, %v2497_v30  ;;  %v2619_v9 = vpop.f32.mrb[29].mxu0 }
 0xb4b   :  { %v2620_v42 = vadd.f32 %v2619_v9, %v2492_v18 }
 0xb4c   :  { %v2659_v43 = vmax.f32 %v2625_v41, 0.0 }
 0xb4d   :  { %v2658_v29 = vmax.f32 %v2620_v42, 0.0  ;;  %v3476_v12 = vpop.f32.mrb[30].mxu0 }
 0xb4e   :  { %v2635_v45 = vadd.f32 %v3476_v12, %v2507_v28  ;;  %v2629_v49 = vpop.f32.mrb[31].mxu0 }
 0xb4f   :  { %v3667_v53 = vpack.c.bf16 %v2659_v43, %v2658_v29  ;;  %v2630_v55 = vadd.f32 %v2629_v49, %v2502_v40 }
 0xb50   :  { %v2661_v56 = vmax.f32 %v2635_v45, 0.0 }
 0xb51   :  { %v2660_v61 = vmax.f32 %v2630_v55, 0.0  ;;  %v3479_v62 = vpop.f32.mrb[32].mxu0  ;;  %3668 = vmatpush3.bf16.msra.mxu1 %v3667_v53 }
 0xb52   :  { %v2645_v44 = vadd.f32 %v3479_v62, %v2517_v23  ;;  %v2639_v60 = vpop.f32.mrb[33].mxu0  ;;  %3669 = vmatprep.subr.bf16.mxu1 %v3767_v58 }
 0xb53   :  { %v3670_v57 = vpack.c.bf16 %v2661_v56, %v2660_v61  ;;  %v2640_v46 = vadd.f32 %v2639_v60, %v2512_v36 }
 0xb54   :  { %v2663_v54 = vmax.f32 %v2645_v44, 0.0 }
 0xb55   :  { %v2662_v6 = vmax.f32 %v2640_v46, 0.0  ;;  %v3482_v47 = vpop.f32.mrb[34].mxu0  ;;  %3671 = vmatpush3.bf16.msra.mxu1 %v3670_v57 }
 0xb56   :  { %v2655_v20 = vadd.f32 %v3482_v47, %v2527_v63  ;;  %v2649_v59 = vpop.f32.mrb[35].mxu0  ;;  %3672 = vmatprep.subr.bf16.mxu1 %v3767_v58 }
 0xb57   :  { %v3673_v22 = vpack.c.bf16 %v2663_v54, %v2662_v6  ;;  %v2650_v19 = vadd.f32 %v2649_v59, %v2522_v11 }
 0xb58   :  { %v2665_v26 = vmax.f32 %v2655_v20, 0.0 }
 0xb59   :  { %v2664_v32 = vmax.f32 %v2650_v19, 0.0  ;;  %3674 = vmatpush3.bf16.msra.mxu1 %v3673_v22 }
 0xb5a   :  { %3675 = vmatprep.subr.bf16.mxu1 %v3767_v58 }
 0xb5b   :  { %v3676_v16 = vpack.c.bf16 %v2665_v26, %v2664_v32 }
 0xb5d   :  { %3677 = vmatpush3.bf16.msra.mxu1 %v3676_v16 }
 0xb60   :  { %3500 = vmatmul.mubr.msk.f32.vlgmr.msra.gmra.mrb[34].mxu1 %vm276_vm0, %v2666_v51 }
 0xc33   :  { %v2742_v38 = vpop.f32.mrb[34].mxu1 }
 0xc34   :  { %v2743_v52 = vadd.f32 %v2742_v38, %v2671_v34  ;;  %v3501_v8 = vpop.f32.mrb[35].mxu1 }
 0xc36   :  { %3737 = vtanh.f32 %v2743_v52  ;;  %v2755_v3 = vmul.f32 %v2753_v14, %v2743_v52 }
 0xc38   :  { %v2757_v4 = vrot.slane %v2755_v3, 2 }
 0xc3a   :  { %v2759_v37 = vsub.f32 %v4586_v31, %v2757_v4 }
 0xc3c   :  { %v2760_v7 = vmul.f32 %v2759_v37, %v2750_v21 }
 0xc40   :  { %v3738_v35 = vpop.eup %3737 }
 0xc41   :  { %v2752_v0 = vmul.f32 %v3738_v35, %v2750_v21 }
 0xc43   :  { %v2761_v17 = vsub.f32 0.0, %v2752_v0  ;;  %v2766_v58 = vsel %vm711_vm2, %v2752_v0, 0.0 }
 0xc44   :  { %v2767_v15 = vrot.slane %v2766_v58, 4 }
 0xc45   :  { %v2762_v1 = vmul.f32 1.442695, %v2761_v17 }
 0xc46   :  { %v2768_v27 = vadd.f32 %v2767_v15, %v2766_v58 }
 0xc47   :  { %3739 = vpow2.f32 %v2762_v1 }
 0xc48   :  { %v2769_v48 = vrot.slane %v2768_v27, 2 }
 0xc4a   :  { %v2770_v5 = vadd.f32 %v2769_v48, %v2768_v27 }
 0xc4c   :  { %v2771_v24 = vrot.slane %v2770_v5, 1 }
 0xc4e   :  { %v2772_v10 = vadd.f32 %v2771_v24, %v2770_v5 }
 0xc50   :  { %v2773_v25 = vadd.f32 %v2772_v10, %v4583_v13 }
 0xc51   :  { %v3740_v2 = vpop.eup %3739 }
 0xc52   :  { %v2764_v39 = vmul.f32 %v3740_v2, %v2760_v7 }
 0xc54   :  { %v2765_v30 = vadd.f32 %v2764_v39, %v4589_v50 }
 0xc56   :  { %v2774_v18 = vmul.f32 %v2765_v30, %v2765_v30 }
 0xc58   :  { %v2775_v28 = vsel %vm711_vm2, %v2774_v18, 0.0 }
 0xc59   :  { %v2776_v33 = vrot.slane %v2775_v28, 4 }
 0xc5b   :  { %v2777_v40 = vadd.f32 %v2776_v33, %v2775_v28 }
 0xc5d   :  { %v2778_v41 = vrot.slane %v2777_v40, 2 }
 0xc5f   :  { %v2779_v9 = vadd.f32 %v2778_v41, %v2777_v40 }
 0xc61   :  { %v2780_v42 = vrot.slane %v2779_v9, 1 }
 0xc63   :  { %v2781_v43 = vadd.f32 %v2780_v42, %v2779_v9 }
 0xc65   :  { %v2782_v29 = vmul.f32 -0.5, %v2781_v43 }
 0xc67   :  { %v3037_v31 = vadd.f32 -1.837877, %v2782_v29 }
 0xc69   :  { %v2784_v12 = vsub.f32 %v2773_v25, %v3037_v31 }
 0xc6b   :  { %2785 = vst [vmem:[#allocation2] sm:$0x1] %v2784_v12 }
 0xc6c   :  { %3752 = shalt.err (!%p3749_p4)
}
 0xc6d   :  { %s3753_s3 = scalar_lea.hbm %s4694_s8, 16 }
 0xc6e   :  { %p3754_p5 = scmp.ne.s32.totalorder %s4694_s8, %s3753_s3  ;;  %p3757_p6 = scmp.lt.u32.totalorder %s3753_s3, %s4694_s8 }
 0xc70   :  { %p3759_p7 = pnand %p3757_p6, %p3754_p5 }
 0xc72   :  { %3762 = shalt.err (!%p3759_p7)
}
 0xc73   :  { %2795 = dma.vmem_to_hbm [thread:$0]  %s2793_s11, 16, %s4694_s8, [#allocation3]  }
 0xc74   :  { %3763 = dma.done.wait [#allocation3], 16  }
 0xc75   :  { %3764 = vsyncadd [#allocation3], 4294967280 }
 0xc76   :  { %2799 = vsyncpa [#allocation3], 1 }

</bundles_post_ra>
